<compile_context>
chip_gen: v5e
topology: v5e:2x2
jax: 0.10.0
libtpu: 0.0.40
codegen_flags: <defaults>
</compile_context>

<pallas_src>
import functools
import numpy as np

import jax
import jax.numpy as jnp
from jax import lax
from jax.experimental import pallas as pl
from jax.experimental.pallas import tpu as pltpu


# ---------------------------------------------------------------------------
# Kernel: full transformer (all layers) for a single batch element.
# ---------------------------------------------------------------------------
def _layer_norm(x, gamma, beta, eps=1e-6):
    mu = jnp.mean(x, axis=-1, keepdims=True)
    var = jnp.mean(jnp.square(x - mu), axis=-1, keepdims=True)
    return (x - mu) * lax.rsqrt(var + eps) * gamma + beta


def _transformer_kernel(num_layers, num_heads, head_dim,
                        x_ref, mbias_ref,
                        wqkv_ref, bqkv_ref, wp_ref, bp_ref,
                        g1_ref, be1_ref,
                        w1_ref, b1_ref, w2_ref, b2_ref,
                        g2_ref, be2_ref,
                        o_ref):
    S, D = x_ref.shape
    x = x_ref[...]            # (S, D)
    mbias = mbias_ref[...]    # (1, S)  additive key-axis bias: -10000 * (1 - mask)

    scale = jnp.float32(1.0 / np.sqrt(head_dim))
    inv_sqrt2 = jnp.float32(1.0 / np.sqrt(2.0))

    for l in range(num_layers):            # static unrolled layer loop; weights in VMEM
        # ---- pre-LN 1 (eps = 1e-6) ----
        xn = _layer_norm(x, g1_ref[l], be1_ref[l])

        # ---- fused QKV projection: one (S,D) x (D,3D) matmul ----
        qkv = jnp.dot(xn, wqkv_ref[l], preferred_element_type=jnp.float32) + bqkv_ref[l]
        q = qkv[:, 0 * D:1 * D] * scale     # fold 1/sqrt(head_dim) into q once
        k = qkv[:, 1 * D:2 * D]
        v = qkv[:, 2 * D:3 * D]

        # ---- batched multi-head attention (no per-head loop / concatenate) ----
        qh = q.reshape(S, num_heads, head_dim).transpose(1, 0, 2)   # (H, S, W)
        kh = k.reshape(S, num_heads, head_dim).transpose(1, 0, 2)   # (H, S, W)
        vh = v.reshape(S, num_heads, head_dim).transpose(1, 0, 2)   # (H, S, W)

        scores = jnp.einsum('hqw,hkw->hqk', qh, kh,
                            preferred_element_type=jnp.float32)     # (H, S, S)
        scores = scores + mbias                                     # (1,S) -> key axis
        # manual softmax; normalization reciprocal goes to the EUP
        scores = scores - jnp.max(scores, axis=-1, keepdims=True)
        p = jnp.exp(scores)
        p = p * pl.reciprocal(jnp.sum(p, axis=-1, keepdims=True), approx=True)

        ctx = jnp.einsum('hqk,hkw->hqw', p, vh,
                         preferred_element_type=jnp.float32)        # (H, S, W)
        attn = ctx.transpose(1, 0, 2).reshape(S, D)                 # (S, D)

        # ---- output projection + residual ----
        x = x + (jnp.dot(attn, wp_ref[l], preferred_element_type=jnp.float32)
                 + bp_ref[l])

        # ---- pre-LN 2 + position-wise FFN (exact erf GELU) + residual ----
        xn2 = _layer_norm(x, g2_ref[l], be2_ref[l])
        hff = jnp.dot(xn2, w1_ref[l], preferred_element_type=jnp.float32) + b1_ref[l]
        hff = 0.5 * hff * (1.0 + lax.erf(hff * inv_sqrt2))
        hff = jnp.dot(hff, w2_ref[l], preferred_element_type=jnp.float32) + b2_ref[l]
        x = x + hff

    o_ref[...] = x


# ---------------------------------------------------------------------------
# Wrapper: one pallas_call for the whole Transformer, grid over batch only.
# ---------------------------------------------------------------------------
def transformer_forward(x, params, mask=None, num_heads=4):
    B, S, D = x.shape
    L = params["wqkv"].shape[0]
    F = params["w1"].shape[2]
    head_dim = D // num_heads

    if mask is None:
        mask = jnp.ones((B, S), jnp.float32)
    # additive bias, matching: scores -= 10000.0 * (1.0 - mask)
    mask_bias = (-10000.0 * (1.0 - mask.astype(jnp.float32))).reshape(B, 1, S)

    def wspec(shape):
        # layer-stacked weight, constant block index, fully resident in VMEM
        return pl.BlockSpec(shape, lambda b: (0,) * len(shape))

    in_specs = [
        pl.BlockSpec((None, S, D), lambda b: (b, 0, 0)),    # x        -> (S, D)
        pl.BlockSpec((None, 1, S), lambda b: (b, 0, 0)),    # mask bias-> (1, S)
        wspec((L, D, 3 * D)), wspec((L, 1, 3 * D)),         # wqkv, bqkv
        wspec((L, D, D)),     wspec((L, 1, D)),             # wp, bp
        wspec((L, 1, D)),     wspec((L, 1, D)),             # norm1 gamma, beta
        wspec((L, D, F)),     wspec((L, 1, F)),             # fc1 W, b
        wspec((L, F, D)),     wspec((L, 1, D)),             # fc2 W, b
        wspec((L, 1, D)),     wspec((L, 1, D)),             # norm2 gamma, beta
    ]

    kernel = functools.partial(_transformer_kernel, L, num_heads, head_dim)

    return pl.pallas_call(
        kernel,
        out_shape=jax.ShapeDtypeStruct((B, S, D), jnp.float32),
        grid=(B,),
        in_specs=in_specs,
        out_specs=pl.BlockSpec((None, S, D), lambda b: (b, 0, 0)),
        compiler_params=pltpu.CompilerParams(
            dimension_semantics=("parallel",)),
    )(
        x, mask_bias,
        params["wqkv"], params["bqkv"], params["wp"], params["bp"],
        params["g1"], params["be1"],
        params["w1"], params["b1"], params["w2"], params["b2"],
        params["g2"], params["be2"],
    )


# ---------------------------------------------------------------------------
# Deterministic parameter init (synthetic; not a checkpoint load).
# Returns layer-stacked arrays of shape (L, ...).
# ---------------------------------------------------------------------------
def init_params(key, dim, ff_dim, num_layers):
    def w(k, shp):
        return 0.02 * jax.random.normal(k, shp, jnp.float32)

    layers = []
    for layer in range(num_layers):
        lkey = jax.random.fold_in(key, layer)
        ks = jax.random.split(lkey, 12)
        wq, wk, wv = w(ks[0], (dim, dim)), w(ks[2], (dim, dim)), w(ks[4], (dim, dim))
        bq, bk, bv = w(ks[1], (1, dim)), w(ks[3], (1, dim)), w(ks[5], (1, dim))
        layers.append(dict(
            wqkv=jnp.concatenate([wq, wk, wv], axis=1),   # (D, 3D)
            bqkv=jnp.concatenate([bq, bk, bv], axis=1),   # (1, 3D)
            wp=w(ks[6], (dim, dim)),   bp=w(ks[7], (1, dim)),
            g1=jnp.ones((1, dim), jnp.float32),  be1=jnp.zeros((1, dim), jnp.float32),
            w1=w(ks[8], (dim, ff_dim)), b1=w(ks[9], (1, ff_dim)),
            w2=w(ks[10], (ff_dim, dim)), b2=w(ks[11], (1, dim)),
            g2=jnp.ones((1, dim), jnp.float32),  be2=jnp.zeros((1, dim), jnp.float32),
        ))
    # stack per-layer dicts into a dict of (L, ...) arrays
    return {k: jnp.stack([p[k] for p in layers], axis=0) for k in layers[0]}


if __name__ == "__main__":
    # Small shapes consistent with the module's forward: (B, S, D)
    B, S, D = 2, 8, 32
    NUM_HEADS, FF_DIM, NUM_LAYERS = 4, 64, 2

    key = jax.random.PRNGKey(0)
    kx, kp = jax.random.split(key)
    x = jax.random.normal(kx, (B, S, D), jnp.float32)

    # mask (B, S): batch 1 has its last two positions masked out
    mask = jnp.ones((B, S), jnp.float32)
    mask = mask.at[1, -2:].set(0.0)

    params = init_params(kp, D, FF_DIM, NUM_LAYERS)

    out = transformer_forward(x, params, mask=mask, num_heads=NUM_HEADS)
    out = jax.block_until_ready(out)
    assert out.shape == (B, S, D) and out.dtype == jnp.float32
    print("KERNEL_OK")
</pallas_src>

<mosaic_0001>
module attributes {stable_mosaic.version = 11 : i64} {
  func.func @_transformer_kernel(%arg0: i32, %arg1: memref<1x8x32xf32, #tpu.memory_space<vmem>>, %arg2: memref<1x1x8xf32, #tpu.memory_space<vmem>>, %arg3: memref<2x32x96xf32, #tpu.memory_space<vmem>>, %arg4: memref<2x1x96xf32, #tpu.memory_space<vmem>>, %arg5: memref<2x32x32xf32, #tpu.memory_space<vmem>>, %arg6: memref<2x1x32xf32, #tpu.memory_space<vmem>>, %arg7: memref<2x1x32xf32, #tpu.memory_space<vmem>>, %arg8: memref<2x1x32xf32, #tpu.memory_space<vmem>>, %arg9: memref<2x32x64xf32, #tpu.memory_space<vmem>>, %arg10: memref<2x1x64xf32, #tpu.memory_space<vmem>>, %arg11: memref<2x64x32xf32, #tpu.memory_space<vmem>>, %arg12: memref<2x1x32xf32, #tpu.memory_space<vmem>>, %arg13: memref<2x1x32xf32, #tpu.memory_space<vmem>>, %arg14: memref<2x1x32xf32, #tpu.memory_space<vmem>>, %arg15: memref<1x8x32xf32, #tpu.memory_space<vmem>>) attributes {dimension_semantics = [#tpu.dimension_semantics<parallel>], iteration_bounds = array<i64: 2>, scalar_prefetch = 0 : i64, scratch_operands = 0 : i64, tpu.core_type = #tpu.core_type<tc>, window_params = [{transform_indices = @transform_0, window_bounds = array<i64: 1, 8, 32>}, {transform_indices = @transform_1, window_bounds = array<i64: 1, 1, 8>}, {pipeline_mode = #tpu.pipeline_mode<synchronous>, transform_indices = @transform_2, window_bounds = array<i64: 2, 32, 96>}, {pipeline_mode = #tpu.pipeline_mode<synchronous>, transform_indices = @transform_3, window_bounds = array<i64: 2, 1, 96>}, {pipeline_mode = #tpu.pipeline_mode<synchronous>, transform_indices = @transform_4, window_bounds = array<i64: 2, 32, 32>}, {pipeline_mode = #tpu.pipeline_mode<synchronous>, transform_indices = @transform_5, window_bounds = array<i64: 2, 1, 32>}, {pipeline_mode = #tpu.pipeline_mode<synchronous>, transform_indices = @transform_6, window_bounds = array<i64: 2, 1, 32>}, {pipeline_mode = #tpu.pipeline_mode<synchronous>, transform_indices = @transform_7, window_bounds = array<i64: 2, 1, 32>}, {pipeline_mode = #tpu.pipeline_mode<synchronous>, transform_indices = @transform_8, window_bounds = array<i64: 2, 32, 64>}, {pipeline_mode = #tpu.pipeline_mode<synchronous>, transform_indices = @transform_9, window_bounds = array<i64: 2, 1, 64>}, {pipeline_mode = #tpu.pipeline_mode<synchronous>, transform_indices = @transform_10, window_bounds = array<i64: 2, 64, 32>}, {pipeline_mode = #tpu.pipeline_mode<synchronous>, transform_indices = @transform_11, window_bounds = array<i64: 2, 1, 32>}, {pipeline_mode = #tpu.pipeline_mode<synchronous>, transform_indices = @transform_12, window_bounds = array<i64: 2, 1, 32>}, {pipeline_mode = #tpu.pipeline_mode<synchronous>, transform_indices = @transform_13, window_bounds = array<i64: 2, 1, 32>}, {transform_indices = @transform_14, window_bounds = array<i64: 1, 8, 32>}]} {
    %c0 = arith.constant 0 : index
    %c0_0 = arith.constant 0 : index
    %c0_1 = arith.constant 0 : index
    %0 = vector.load %arg1[%c0, %c0_0, %c0_1] : memref<1x8x32xf32, #tpu.memory_space<vmem>>, vector<1x8x32xf32>
    %1 = vector.shape_cast %0 : vector<1x8x32xf32> to vector<8x32xf32>
    %c0_2 = arith.constant 0 : index
    %c0_3 = arith.constant 0 : index
    %c0_4 = arith.constant 0 : index
    %2 = vector.load %arg2[%c0_2, %c0_3, %c0_4] : memref<1x1x8xf32, #tpu.memory_space<vmem>>, vector<1x1x8xf32>
    %3 = vector.shape_cast %2 : vector<1x1x8xf32> to vector<1x8xf32>
    %c0_5 = arith.constant 0 : index
    %c0_6 = arith.constant 0 : index
    %c0_7 = arith.constant 0 : index
    %4 = vector.load %arg7[%c0_5, %c0_6, %c0_7] : memref<2x1x32xf32, #tpu.memory_space<vmem>>, vector<1x1x32xf32>
    %5 = vector.shape_cast %4 : vector<1x1x32xf32> to vector<1x32xf32>
    %c0_8 = arith.constant 0 : index
    %c0_9 = arith.constant 0 : index
    %c0_10 = arith.constant 0 : index
    %6 = vector.load %arg8[%c0_8, %c0_9, %c0_10] : memref<2x1x32xf32, #tpu.memory_space<vmem>>, vector<1x1x32xf32>
    %7 = vector.shape_cast %6 : vector<1x1x32xf32> to vector<1x32xf32>
    %cst = arith.constant dense<0.000000e+00> : vector<8xf32>
    %8 = vector.multi_reduction <add>, %1, %cst [1] : vector<8x32xf32> to vector<8xf32>
    %9 = vector.shape_cast %8 : vector<8xf32> to vector<8x1xf32>
    %cst_11 = arith.constant 3.200000e+01 : f32
    %10 = vector.broadcast %cst_11 : f32 to vector<8x1xf32>
    %11 = arith.divf %9, %10 : vector<8x1xf32>
    %12 = vector.broadcast %11 : vector<8x1xf32> to vector<8x32xf32>
    %13 = arith.subf %1, %12 : vector<8x32xf32>
    %14 = arith.mulf %13, %13 : vector<8x32xf32>
    %cst_12 = arith.constant dense<0.000000e+00> : vector<8xf32>
    %15 = vector.multi_reduction <add>, %14, %cst_12 [1] : vector<8x32xf32> to vector<8xf32>
    %16 = vector.shape_cast %15 : vector<8xf32> to vector<8x1xf32>
    %cst_13 = arith.constant 3.200000e+01 : f32
    %17 = vector.broadcast %cst_13 : f32 to vector<8x1xf32>
    %18 = arith.divf %16, %17 : vector<8x1xf32>
    %19 = vector.broadcast %11 : vector<8x1xf32> to vector<8x32xf32>
    %20 = arith.subf %1, %19 : vector<8x32xf32>
    %cst_14 = arith.constant 9.99999997E-7 : f32
    %21 = vector.broadcast %cst_14 : f32 to vector<8x1xf32>
    %22 = arith.addf %18, %21 : vector<8x1xf32>
    %23 = math.rsqrt %22 : vector<8x1xf32>
    %24 = vector.broadcast %23 : vector<8x1xf32> to vector<8x32xf32>
    %25 = arith.mulf %20, %24 : vector<8x32xf32>
    %26 = vector.broadcast %5 : vector<1x32xf32> to vector<8x32xf32>
    %27 = arith.mulf %25, %26 : vector<8x32xf32>
    %28 = vector.broadcast %7 : vector<1x32xf32> to vector<8x32xf32>
    %29 = arith.addf %27, %28 : vector<8x32xf32>
    %c0_15 = arith.constant 0 : index
    %c0_16 = arith.constant 0 : index
    %c0_17 = arith.constant 0 : index
    %30 = vector.load %arg3[%c0_15, %c0_16, %c0_17] : memref<2x32x96xf32, #tpu.memory_space<vmem>>, vector<1x32x96xf32>
    %31 = vector.shape_cast %30 : vector<1x32x96xf32> to vector<32x96xf32>
    %cst_18 = arith.constant dense<0.000000e+00> : vector<8x96xf32>
    %32 = tpu.matmul %29, %31, %cst_18 {dimension_numbers = #tpu.dot_dimension_numbers<[1], [0], [0], [1], [0, 0, 1, 1], [], []>} : vector<8x32xf32>, vector<32x96xf32>, vector<8x96xf32> -> vector<8x96xf32>
    %c0_19 = arith.constant 0 : index
    %c0_20 = arith.constant 0 : index
    %c0_21 = arith.constant 0 : index
    %33 = vector.load %arg4[%c0_19, %c0_20, %c0_21] : memref<2x1x96xf32, #tpu.memory_space<vmem>>, vector<1x1x96xf32>
    %34 = vector.shape_cast %33 : vector<1x1x96xf32> to vector<1x96xf32>
    %35 = vector.broadcast %34 : vector<1x96xf32> to vector<8x96xf32>
    %36 = arith.addf %32, %35 : vector<8x96xf32>
    %37 = vector.extract_strided_slice %36 {offsets = [0, 0], sizes = [8, 32], strides = [1, 1]} : vector<8x96xf32> to vector<8x32xf32>
    %cst_22 = arith.constant 0.353553385 : f32
    %38 = vector.broadcast %cst_22 : f32 to vector<8x32xf32>
    %39 = arith.mulf %37, %38 : vector<8x32xf32>
    %40 = vector.extract_strided_slice %36 {offsets = [0, 32], sizes = [8, 32], strides = [1, 1]} : vector<8x96xf32> to vector<8x32xf32>
    %41 = vector.extract_strided_slice %36 {offsets = [0, 64], sizes = [8, 32], strides = [1, 1]} : vector<8x96xf32> to vector<8x32xf32>
    %42 = vector.shape_cast %39 : vector<8x32xf32> to vector<8x4x8xf32>
    %43 = tpu.transpose %42, [1, 0, 2] : vector<8x4x8xf32> -> vector<4x8x8xf32>
    %44 = vector.shape_cast %40 : vector<8x32xf32> to vector<8x4x8xf32>
    %45 = tpu.transpose %44, [1, 0, 2] : vector<8x4x8xf32> -> vector<4x8x8xf32>
    %46 = vector.shape_cast %41 : vector<8x32xf32> to vector<8x4x8xf32>
    %47 = tpu.transpose %46, [1, 0, 2] : vector<8x4x8xf32> -> vector<4x8x8xf32>
    "tpu.trace_start"() <{level = 10 : i32, message = "hqw,hkw->hqk"}> : () -> ()
    %cst_23 = arith.constant dense<0.000000e+00> : vector<4x8x8xf32>
    %48 = tpu.matmul %43, %45, %cst_23 {dimension_numbers = #tpu.dot_dimension_numbers<[2], [2], [1], [1], [0, 0, 0, 1, 1, 1], [0], [0]>} : vector<4x8x8xf32>, vector<4x8x8xf32>, vector<4x8x8xf32> -> vector<4x8x8xf32>
    "tpu.trace_stop"() : () -> ()
    %49 = vector.shape_cast %3 : vector<1x8xf32> to vector<1x1x8xf32>
    %50 = vector.broadcast %49 : vector<1x1x8xf32> to vector<4x8x8xf32>
    %51 = arith.addf %48, %50 : vector<4x8x8xf32>
    %cst_24 = arith.constant dense<0xFF800000> : vector<4x8xf32>
    %52 = vector.multi_reduction <maximumf>, %51, %cst_24 [2] : vector<4x8x8xf32> to vector<4x8xf32>
    %53 = vector.shape_cast %52 : vector<4x8xf32> to vector<4x8x1xf32>
    %54 = vector.broadcast %53 : vector<4x8x1xf32> to vector<4x8x8xf32>
    %55 = arith.subf %51, %54 : vector<4x8x8xf32>
    %56 = math.exp %55 : vector<4x8x8xf32>
    %cst_25 = arith.constant dense<0.000000e+00> : vector<4x8xf32>
    %57 = vector.multi_reduction <add>, %56, %cst_25 [2] : vector<4x8x8xf32> to vector<4x8xf32>
    %58 = vector.shape_cast %57 : vector<4x8xf32> to vector<4x8x1xf32>
    %59 = tpu.reciprocal %58 {approx = true} : vector<4x8x1xf32> -> vector<4x8x1xf32>
    %60 = vector.broadcast %59 : vector<4x8x1xf32> to vector<4x8x8xf32>
    %61 = arith.mulf %56, %60 : vector<4x8x8xf32>
    "tpu.trace_start"() <{level = 10 : i32, message = "hqk,hkw->hqw"}> : () -> ()
    %cst_26 = arith.constant dense<0.000000e+00> : vector<4x8x8xf32>
    %62 = tpu.matmul %61, %47, %cst_26 {dimension_numbers = #tpu.dot_dimension_numbers<[2], [1], [1], [2], [0, 0, 0, 1, 1, 2], [0], [0]>} : vector<4x8x8xf32>, vector<4x8x8xf32>, vector<4x8x8xf32> -> vector<4x8x8xf32>
    "tpu.trace_stop"() : () -> ()
    %63 = tpu.transpose %62, [1, 0, 2] : vector<4x8x8xf32> -> vector<8x4x8xf32>
    %64 = vector.shape_cast %63 : vector<8x4x8xf32> to vector<8x32xf32>
    %c0_27 = arith.constant 0 : index
    %c0_28 = arith.constant 0 : index
    %c0_29 = arith.constant 0 : index
    %65 = vector.load %arg5[%c0_27, %c0_28, %c0_29] : memref<2x32x32xf32, #tpu.memory_space<vmem>>, vector<1x32x32xf32>
    %66 = vector.shape_cast %65 : vector<1x32x32xf32> to vector<32x32xf32>
    %cst_30 = arith.constant dense<0.000000e+00> : vector<8x32xf32>
    %67 = tpu.matmul %64, %66, %cst_30 {dimension_numbers = #tpu.dot_dimension_numbers<[1], [0], [0], [1], [0, 0, 1, 1], [], []>} : vector<8x32xf32>, vector<32x32xf32>, vector<8x32xf32> -> vector<8x32xf32>
    %c0_31 = arith.constant 0 : index
    %c0_32 = arith.constant 0 : index
    %c0_33 = arith.constant 0 : index
    %68 = vector.load %arg6[%c0_31, %c0_32, %c0_33] : memref<2x1x32xf32, #tpu.memory_space<vmem>>, vector<1x1x32xf32>
    %69 = vector.shape_cast %68 : vector<1x1x32xf32> to vector<1x32xf32>
    %70 = vector.broadcast %69 : vector<1x32xf32> to vector<8x32xf32>
    %71 = arith.addf %67, %70 : vector<8x32xf32>
    %72 = arith.addf %1, %71 : vector<8x32xf32>
    %c0_34 = arith.constant 0 : index
    %c0_35 = arith.constant 0 : index
    %c0_36 = arith.constant 0 : index
    %73 = vector.load %arg13[%c0_34, %c0_35, %c0_36] : memref<2x1x32xf32, #tpu.memory_space<vmem>>, vector<1x1x32xf32>
    %74 = vector.shape_cast %73 : vector<1x1x32xf32> to vector<1x32xf32>
    %c0_37 = arith.constant 0 : index
    %c0_38 = arith.constant 0 : index
    %c0_39 = arith.constant 0 : index
    %75 = vector.load %arg14[%c0_37, %c0_38, %c0_39] : memref<2x1x32xf32, #tpu.memory_space<vmem>>, vector<1x1x32xf32>
    %76 = vector.shape_cast %75 : vector<1x1x32xf32> to vector<1x32xf32>
    %cst_40 = arith.constant dense<0.000000e+00> : vector<8xf32>
    %77 = vector.multi_reduction <add>, %72, %cst_40 [1] : vector<8x32xf32> to vector<8xf32>
    %78 = vector.shape_cast %77 : vector<8xf32> to vector<8x1xf32>
    %cst_41 = arith.constant 3.200000e+01 : f32
    %79 = vector.broadcast %cst_41 : f32 to vector<8x1xf32>
    %80 = arith.divf %78, %79 : vector<8x1xf32>
    %81 = vector.broadcast %80 : vector<8x1xf32> to vector<8x32xf32>
    %82 = arith.subf %72, %81 : vector<8x32xf32>
    %83 = arith.mulf %82, %82 : vector<8x32xf32>
    %cst_42 = arith.constant dense<0.000000e+00> : vector<8xf32>
    %84 = vector.multi_reduction <add>, %83, %cst_42 [1] : vector<8x32xf32> to vector<8xf32>
    %85 = vector.shape_cast %84 : vector<8xf32> to vector<8x1xf32>
    %cst_43 = arith.constant 3.200000e+01 : f32
    %86 = vector.broadcast %cst_43 : f32 to vector<8x1xf32>
    %87 = arith.divf %85, %86 : vector<8x1xf32>
    %88 = vector.broadcast %80 : vector<8x1xf32> to vector<8x32xf32>
    %89 = arith.subf %72, %88 : vector<8x32xf32>
    %cst_44 = arith.constant 9.99999997E-7 : f32
    %90 = vector.broadcast %cst_44 : f32 to vector<8x1xf32>
    %91 = arith.addf %87, %90 : vector<8x1xf32>
    %92 = math.rsqrt %91 : vector<8x1xf32>
    %93 = vector.broadcast %92 : vector<8x1xf32> to vector<8x32xf32>
    %94 = arith.mulf %89, %93 : vector<8x32xf32>
    %95 = vector.broadcast %74 : vector<1x32xf32> to vector<8x32xf32>
    %96 = arith.mulf %94, %95 : vector<8x32xf32>
    %97 = vector.broadcast %76 : vector<1x32xf32> to vector<8x32xf32>
    %98 = arith.addf %96, %97 : vector<8x32xf32>
    %c0_45 = arith.constant 0 : index
    %c0_46 = arith.constant 0 : index
    %c0_47 = arith.constant 0 : index
    %99 = vector.load %arg9[%c0_45, %c0_46, %c0_47] : memref<2x32x64xf32, #tpu.memory_space<vmem>>, vector<1x32x64xf32>
    %100 = vector.shape_cast %99 : vector<1x32x64xf32> to vector<32x64xf32>
    %cst_48 = arith.constant dense<0.000000e+00> : vector<8x64xf32>
    %101 = tpu.matmul %98, %100, %cst_48 {dimension_numbers = #tpu.dot_dimension_numbers<[1], [0], [0], [1], [0, 0, 1, 1], [], []>} : vector<8x32xf32>, vector<32x64xf32>, vector<8x64xf32> -> vector<8x64xf32>
    %c0_49 = arith.constant 0 : index
    %c0_50 = arith.constant 0 : index
    %c0_51 = arith.constant 0 : index
    %102 = vector.load %arg10[%c0_49, %c0_50, %c0_51] : memref<2x1x64xf32, #tpu.memory_space<vmem>>, vector<1x1x64xf32>
    %103 = vector.shape_cast %102 : vector<1x1x64xf32> to vector<1x64xf32>
    %104 = vector.broadcast %103 : vector<1x64xf32> to vector<8x64xf32>
    %105 = arith.addf %101, %104 : vector<8x64xf32>
    %cst_52 = arith.constant 5.000000e-01 : f32
    %106 = vector.broadcast %cst_52 : f32 to vector<8x64xf32>
    %107 = arith.mulf %106, %105 : vector<8x64xf32>
    %cst_53 = arith.constant 0.707106769 : f32
    %108 = vector.broadcast %cst_53 : f32 to vector<8x64xf32>
    %109 = arith.mulf %105, %108 : vector<8x64xf32>
    %110 = math.erf %109 : vector<8x64xf32>
    %cst_54 = arith.constant 1.000000e+00 : f32
    %111 = vector.broadcast %cst_54 : f32 to vector<8x64xf32>
    %112 = arith.addf %111, %110 : vector<8x64xf32>
    %113 = arith.mulf %107, %112 : vector<8x64xf32>
    %c0_55 = arith.constant 0 : index
    %c0_56 = arith.constant 0 : index
    %c0_57 = arith.constant 0 : index
    %114 = vector.load %arg11[%c0_55, %c0_56, %c0_57] : memref<2x64x32xf32, #tpu.memory_space<vmem>>, vector<1x64x32xf32>
    %115 = vector.shape_cast %114 : vector<1x64x32xf32> to vector<64x32xf32>
    %cst_58 = arith.constant dense<0.000000e+00> : vector<8x32xf32>
    %116 = tpu.matmul %113, %115, %cst_58 {dimension_numbers = #tpu.dot_dimension_numbers<[1], [0], [0], [1], [0, 0, 1, 1], [], []>} : vector<8x64xf32>, vector<64x32xf32>, vector<8x32xf32> -> vector<8x32xf32>
    %c0_59 = arith.constant 0 : index
    %c0_60 = arith.constant 0 : index
    %c0_61 = arith.constant 0 : index
    %117 = vector.load %arg12[%c0_59, %c0_60, %c0_61] : memref<2x1x32xf32, #tpu.memory_space<vmem>>, vector<1x1x32xf32>
    %118 = vector.shape_cast %117 : vector<1x1x32xf32> to vector<1x32xf32>
    %119 = vector.broadcast %118 : vector<1x32xf32> to vector<8x32xf32>
    %120 = arith.addf %116, %119 : vector<8x32xf32>
    %121 = arith.addf %72, %120 : vector<8x32xf32>
    %c1 = arith.constant 1 : index
    %c0_62 = arith.constant 0 : index
    %c0_63 = arith.constant 0 : index
    %122 = vector.load %arg7[%c1, %c0_62, %c0_63] : memref<2x1x32xf32, #tpu.memory_space<vmem>>, vector<1x1x32xf32>
    %123 = vector.shape_cast %122 : vector<1x1x32xf32> to vector<1x32xf32>
    %c1_64 = arith.constant 1 : index
    %c0_65 = arith.constant 0 : index
    %c0_66 = arith.constant 0 : index
    %124 = vector.load %arg8[%c1_64, %c0_65, %c0_66] : memref<2x1x32xf32, #tpu.memory_space<vmem>>, vector<1x1x32xf32>
    %125 = vector.shape_cast %124 : vector<1x1x32xf32> to vector<1x32xf32>
    %cst_67 = arith.constant dense<0.000000e+00> : vector<8xf32>
    %126 = vector.multi_reduction <add>, %121, %cst_67 [1] : vector<8x32xf32> to vector<8xf32>
    %127 = vector.shape_cast %126 : vector<8xf32> to vector<8x1xf32>
    %cst_68 = arith.constant 3.200000e+01 : f32
    %128 = vector.broadcast %cst_68 : f32 to vector<8x1xf32>
    %129 = arith.divf %127, %128 : vector<8x1xf32>
    %130 = vector.broadcast %129 : vector<8x1xf32> to vector<8x32xf32>
    %131 = arith.subf %121, %130 : vector<8x32xf32>
    %132 = arith.mulf %131, %131 : vector<8x32xf32>
    %cst_69 = arith.constant dense<0.000000e+00> : vector<8xf32>
    %133 = vector.multi_reduction <add>, %132, %cst_69 [1] : vector<8x32xf32> to vector<8xf32>
    %134 = vector.shape_cast %133 : vector<8xf32> to vector<8x1xf32>
    %cst_70 = arith.constant 3.200000e+01 : f32
    %135 = vector.broadcast %cst_70 : f32 to vector<8x1xf32>
    %136 = arith.divf %134, %135 : vector<8x1xf32>
    %137 = vector.broadcast %129 : vector<8x1xf32> to vector<8x32xf32>
    %138 = arith.subf %121, %137 : vector<8x32xf32>
    %cst_71 = arith.constant 9.99999997E-7 : f32
    %139 = vector.broadcast %cst_71 : f32 to vector<8x1xf32>
    %140 = arith.addf %136, %139 : vector<8x1xf32>
    %141 = math.rsqrt %140 : vector<8x1xf32>
    %142 = vector.broadcast %141 : vector<8x1xf32> to vector<8x32xf32>
    %143 = arith.mulf %138, %142 : vector<8x32xf32>
    %144 = vector.broadcast %123 : vector<1x32xf32> to vector<8x32xf32>
    %145 = arith.mulf %143, %144 : vector<8x32xf32>
    %146 = vector.broadcast %125 : vector<1x32xf32> to vector<8x32xf32>
    %147 = arith.addf %145, %146 : vector<8x32xf32>
    %c1_72 = arith.constant 1 : index
    %c0_73 = arith.constant 0 : index
    %c0_74 = arith.constant 0 : index
    %148 = vector.load %arg3[%c1_72, %c0_73, %c0_74] : memref<2x32x96xf32, #tpu.memory_space<vmem>>, vector<1x32x96xf32>
    %149 = vector.shape_cast %148 : vector<1x32x96xf32> to vector<32x96xf32>
    %cst_75 = arith.constant dense<0.000000e+00> : vector<8x96xf32>
    %150 = tpu.matmul %147, %149, %cst_75 {dimension_numbers = #tpu.dot_dimension_numbers<[1], [0], [0], [1], [0, 0, 1, 1], [], []>} : vector<8x32xf32>, vector<32x96xf32>, vector<8x96xf32> -> vector<8x96xf32>
    %c1_76 = arith.constant 1 : index
    %c0_77 = arith.constant 0 : index
    %c0_78 = arith.constant 0 : index
    %151 = vector.load %arg4[%c1_76, %c0_77, %c0_78] : memref<2x1x96xf32, #tpu.memory_space<vmem>>, vector<1x1x96xf32>
    %152 = vector.shape_cast %151 : vector<1x1x96xf32> to vector<1x96xf32>
    %153 = vector.broadcast %152 : vector<1x96xf32> to vector<8x96xf32>
    %154 = arith.addf %150, %153 : vector<8x96xf32>
    %155 = vector.extract_strided_slice %154 {offsets = [0, 0], sizes = [8, 32], strides = [1, 1]} : vector<8x96xf32> to vector<8x32xf32>
    %cst_79 = arith.constant 0.353553385 : f32
    %156 = vector.broadcast %cst_79 : f32 to vector<8x32xf32>
    %157 = arith.mulf %155, %156 : vector<8x32xf32>
    %158 = vector.extract_strided_slice %154 {offsets = [0, 32], sizes = [8, 32], strides = [1, 1]} : vector<8x96xf32> to vector<8x32xf32>
    %159 = vector.extract_strided_slice %154 {offsets = [0, 64], sizes = [8, 32], strides = [1, 1]} : vector<8x96xf32> to vector<8x32xf32>
    %160 = vector.shape_cast %157 : vector<8x32xf32> to vector<8x4x8xf32>
    %161 = tpu.transpose %160, [1, 0, 2] : vector<8x4x8xf32> -> vector<4x8x8xf32>
    %162 = vector.shape_cast %158 : vector<8x32xf32> to vector<8x4x8xf32>
    %163 = tpu.transpose %162, [1, 0, 2] : vector<8x4x8xf32> -> vector<4x8x8xf32>
    %164 = vector.shape_cast %159 : vector<8x32xf32> to vector<8x4x8xf32>
    %165 = tpu.transpose %164, [1, 0, 2] : vector<8x4x8xf32> -> vector<4x8x8xf32>
    "tpu.trace_start"() <{level = 10 : i32, message = "hqw,hkw->hqk"}> : () -> ()
    %cst_80 = arith.constant dense<0.000000e+00> : vector<4x8x8xf32>
    %166 = tpu.matmul %161, %163, %cst_80 {dimension_numbers = #tpu.dot_dimension_numbers<[2], [2], [1], [1], [0, 0, 0, 1, 1, 1], [0], [0]>} : vector<4x8x8xf32>, vector<4x8x8xf32>, vector<4x8x8xf32> -> vector<4x8x8xf32>
    "tpu.trace_stop"() : () -> ()
    %167 = vector.shape_cast %3 : vector<1x8xf32> to vector<1x1x8xf32>
    %168 = vector.broadcast %167 : vector<1x1x8xf32> to vector<4x8x8xf32>
    %169 = arith.addf %166, %168 : vector<4x8x8xf32>
    %cst_81 = arith.constant dense<0xFF800000> : vector<4x8xf32>
    %170 = vector.multi_reduction <maximumf>, %169, %cst_81 [2] : vector<4x8x8xf32> to vector<4x8xf32>
    %171 = vector.shape_cast %170 : vector<4x8xf32> to vector<4x8x1xf32>
    %172 = vector.broadcast %171 : vector<4x8x1xf32> to vector<4x8x8xf32>
    %173 = arith.subf %169, %172 : vector<4x8x8xf32>
    %174 = math.exp %173 : vector<4x8x8xf32>
    %cst_82 = arith.constant dense<0.000000e+00> : vector<4x8xf32>
    %175 = vector.multi_reduction <add>, %174, %cst_82 [2] : vector<4x8x8xf32> to vector<4x8xf32>
    %176 = vector.shape_cast %175 : vector<4x8xf32> to vector<4x8x1xf32>
    %177 = tpu.reciprocal %176 {approx = true} : vector<4x8x1xf32> -> vector<4x8x1xf32>
    %178 = vector.broadcast %177 : vector<4x8x1xf32> to vector<4x8x8xf32>
    %179 = arith.mulf %174, %178 : vector<4x8x8xf32>
    "tpu.trace_start"() <{level = 10 : i32, message = "hqk,hkw->hqw"}> : () -> ()
    %cst_83 = arith.constant dense<0.000000e+00> : vector<4x8x8xf32>
    %180 = tpu.matmul %179, %165, %cst_83 {dimension_numbers = #tpu.dot_dimension_numbers<[2], [1], [1], [2], [0, 0, 0, 1, 1, 2], [0], [0]>} : vector<4x8x8xf32>, vector<4x8x8xf32>, vector<4x8x8xf32> -> vector<4x8x8xf32>
    "tpu.trace_stop"() : () -> ()
    %181 = tpu.transpose %180, [1, 0, 2] : vector<4x8x8xf32> -> vector<8x4x8xf32>
    %182 = vector.shape_cast %181 : vector<8x4x8xf32> to vector<8x32xf32>
    %c1_84 = arith.constant 1 : index
    %c0_85 = arith.constant 0 : index
    %c0_86 = arith.constant 0 : index
    %183 = vector.load %arg5[%c1_84, %c0_85, %c0_86] : memref<2x32x32xf32, #tpu.memory_space<vmem>>, vector<1x32x32xf32>
    %184 = vector.shape_cast %183 : vector<1x32x32xf32> to vector<32x32xf32>
    %cst_87 = arith.constant dense<0.000000e+00> : vector<8x32xf32>
    %185 = tpu.matmul %182, %184, %cst_87 {dimension_numbers = #tpu.dot_dimension_numbers<[1], [0], [0], [1], [0, 0, 1, 1], [], []>} : vector<8x32xf32>, vector<32x32xf32>, vector<8x32xf32> -> vector<8x32xf32>
    %c1_88 = arith.constant 1 : index
    %c0_89 = arith.constant 0 : index
    %c0_90 = arith.constant 0 : index
    %186 = vector.load %arg6[%c1_88, %c0_89, %c0_90] : memref<2x1x32xf32, #tpu.memory_space<vmem>>, vector<1x1x32xf32>
    %187 = vector.shape_cast %186 : vector<1x1x32xf32> to vector<1x32xf32>
    %188 = vector.broadcast %187 : vector<1x32xf32> to vector<8x32xf32>
    %189 = arith.addf %185, %188 : vector<8x32xf32>
    %190 = arith.addf %121, %189 : vector<8x32xf32>
    %c1_91 = arith.constant 1 : index
    %c0_92 = arith.constant 0 : index
    %c0_93 = arith.constant 0 : index
    %191 = vector.load %arg13[%c1_91, %c0_92, %c0_93] : memref<2x1x32xf32, #tpu.memory_space<vmem>>, vector<1x1x32xf32>
    %192 = vector.shape_cast %191 : vector<1x1x32xf32> to vector<1x32xf32>
    %c1_94 = arith.constant 1 : index
    %c0_95 = arith.constant 0 : index
    %c0_96 = arith.constant 0 : index
    %193 = vector.load %arg14[%c1_94, %c0_95, %c0_96] : memref<2x1x32xf32, #tpu.memory_space<vmem>>, vector<1x1x32xf32>
    %194 = vector.shape_cast %193 : vector<1x1x32xf32> to vector<1x32xf32>
    %cst_97 = arith.constant dense<0.000000e+00> : vector<8xf32>
    %195 = vector.multi_reduction <add>, %190, %cst_97 [1] : vector<8x32xf32> to vector<8xf32>
    %196 = vector.shape_cast %195 : vector<8xf32> to vector<8x1xf32>
    %cst_98 = arith.constant 3.200000e+01 : f32
    %197 = vector.broadcast %cst_98 : f32 to vector<8x1xf32>
    %198 = arith.divf %196, %197 : vector<8x1xf32>
    %199 = vector.broadcast %198 : vector<8x1xf32> to vector<8x32xf32>
    %200 = arith.subf %190, %199 : vector<8x32xf32>
    %201 = arith.mulf %200, %200 : vector<8x32xf32>
    %cst_99 = arith.constant dense<0.000000e+00> : vector<8xf32>
    %202 = vector.multi_reduction <add>, %201, %cst_99 [1] : vector<8x32xf32> to vector<8xf32>
    %203 = vector.shape_cast %202 : vector<8xf32> to vector<8x1xf32>
    %cst_100 = arith.constant 3.200000e+01 : f32
    %204 = vector.broadcast %cst_100 : f32 to vector<8x1xf32>
    %205 = arith.divf %203, %204 : vector<8x1xf32>
    %206 = vector.broadcast %198 : vector<8x1xf32> to vector<8x32xf32>
    %207 = arith.subf %190, %206 : vector<8x32xf32>
    %cst_101 = arith.constant 9.99999997E-7 : f32
    %208 = vector.broadcast %cst_101 : f32 to vector<8x1xf32>
    %209 = arith.addf %205, %208 : vector<8x1xf32>
    %210 = math.rsqrt %209 : vector<8x1xf32>
    %211 = vector.broadcast %210 : vector<8x1xf32> to vector<8x32xf32>
    %212 = arith.mulf %207, %211 : vector<8x32xf32>
    %213 = vector.broadcast %192 : vector<1x32xf32> to vector<8x32xf32>
    %214 = arith.mulf %212, %213 : vector<8x32xf32>
    %215 = vector.broadcast %194 : vector<1x32xf32> to vector<8x32xf32>
    %216 = arith.addf %214, %215 : vector<8x32xf32>
    %c1_102 = arith.constant 1 : index
    %c0_103 = arith.constant 0 : index
    %c0_104 = arith.constant 0 : index
    %217 = vector.load %arg9[%c1_102, %c0_103, %c0_104] : memref<2x32x64xf32, #tpu.memory_space<vmem>>, vector<1x32x64xf32>
    %218 = vector.shape_cast %217 : vector<1x32x64xf32> to vector<32x64xf32>
    %cst_105 = arith.constant dense<0.000000e+00> : vector<8x64xf32>
    %219 = tpu.matmul %216, %218, %cst_105 {dimension_numbers = #tpu.dot_dimension_numbers<[1], [0], [0], [1], [0, 0, 1, 1], [], []>} : vector<8x32xf32>, vector<32x64xf32>, vector<8x64xf32> -> vector<8x64xf32>
    %c1_106 = arith.constant 1 : index
    %c0_107 = arith.constant 0 : index
    %c0_108 = arith.constant 0 : index
    %220 = vector.load %arg10[%c1_106, %c0_107, %c0_108] : memref<2x1x64xf32, #tpu.memory_space<vmem>>, vector<1x1x64xf32>
    %221 = vector.shape_cast %220 : vector<1x1x64xf32> to vector<1x64xf32>
    %222 = vector.broadcast %221 : vector<1x64xf32> to vector<8x64xf32>
    %223 = arith.addf %219, %222 : vector<8x64xf32>
    %cst_109 = arith.constant 5.000000e-01 : f32
    %224 = vector.broadcast %cst_109 : f32 to vector<8x64xf32>
    %225 = arith.mulf %224, %223 : vector<8x64xf32>
    %cst_110 = arith.constant 0.707106769 : f32
    %226 = vector.broadcast %cst_110 : f32 to vector<8x64xf32>
    %227 = arith.mulf %223, %226 : vector<8x64xf32>
    %228 = math.erf %227 : vector<8x64xf32>
    %cst_111 = arith.constant 1.000000e+00 : f32
    %229 = vector.broadcast %cst_111 : f32 to vector<8x64xf32>
    %230 = arith.addf %229, %228 : vector<8x64xf32>
    %231 = arith.mulf %225, %230 : vector<8x64xf32>
    %c1_112 = arith.constant 1 : index
    %c0_113 = arith.constant 0 : index
    %c0_114 = arith.constant 0 : index
    %232 = vector.load %arg11[%c1_112, %c0_113, %c0_114] : memref<2x64x32xf32, #tpu.memory_space<vmem>>, vector<1x64x32xf32>
    %233 = vector.shape_cast %232 : vector<1x64x32xf32> to vector<64x32xf32>
    %cst_115 = arith.constant dense<0.000000e+00> : vector<8x32xf32>
    %234 = tpu.matmul %231, %233, %cst_115 {dimension_numbers = #tpu.dot_dimension_numbers<[1], [0], [0], [1], [0, 0, 1, 1], [], []>} : vector<8x64xf32>, vector<64x32xf32>, vector<8x32xf32> -> vector<8x32xf32>
    %c1_116 = arith.constant 1 : index
    %c0_117 = arith.constant 0 : index
    %c0_118 = arith.constant 0 : index
    %235 = vector.load %arg12[%c1_116, %c0_117, %c0_118] : memref<2x1x32xf32, #tpu.memory_space<vmem>>, vector<1x1x32xf32>
    %236 = vector.shape_cast %235 : vector<1x1x32xf32> to vector<1x32xf32>
    %237 = vector.broadcast %236 : vector<1x32xf32> to vector<8x32xf32>
    %238 = arith.addf %234, %237 : vector<8x32xf32>
    %239 = arith.addf %190, %238 : vector<8x32xf32>
    %c0_119 = arith.constant 0 : index
    %c0_120 = arith.constant 0 : index
    %c0_121 = arith.constant 0 : index
    %240 = vector.load %arg15[%c0_119, %c0_120, %c0_121] : memref<1x8x32xf32, #tpu.memory_space<vmem>>, vector<1x8x32xf32>
    %241 = vector.shape_cast %240 : vector<1x8x32xf32> to vector<8x32xf32>
    %242 = vector.shape_cast %239 : vector<8x32xf32> to vector<1x8x32xf32>
    tpu.vector_store %arg15[%c0_119, %c0_120, %c0_121], %242 {strides = array<i32>} : memref<1x8x32xf32, #tpu.memory_space<vmem>>, vector<1x8x32xf32>,
    return
  }
  func.func @transform_0(%arg0: i32) -> (i32, i32, i32) {
    %c0_i32 = arith.constant 0 : i32
    %c0_i32_0 = arith.constant 0 : i32
    %c0_i32_1 = arith.constant 0 : i32
    return %arg0, %c0_i32, %c0_i32_0 : i32, i32, i32
  }
  func.func @transform_1(%arg0: i32) -> (i32, i32, i32) {
    %c0_i32 = arith.constant 0 : i32
    %c0_i32_0 = arith.constant 0 : i32
    %c0_i32_1 = arith.constant 0 : i32
    return %arg0, %c0_i32, %c0_i32_0 : i32, i32, i32
  }
  func.func @transform_2(%arg0: i32) -> (i32, i32, i32) {
    %c0_i32 = arith.constant 0 : i32
    %c0_i32_0 = arith.constant 0 : i32
    %c0_i32_1 = arith.constant 0 : i32
    %c0_i32_2 = arith.constant 0 : i32
    return %c0_i32, %c0_i32_0, %c0_i32_1 : i32, i32, i32
  }
  func.func @transform_3(%arg0: i32) -> (i32, i32, i32) {
    %c0_i32 = arith.constant 0 : i32
    %c0_i32_0 = arith.constant 0 : i32
    %c0_i32_1 = arith.constant 0 : i32
    %c0_i32_2 = arith.constant 0 : i32
    return %c0_i32, %c0_i32_0, %c0_i32_1 : i32, i32, i32
  }
  func.func @transform_4(%arg0: i32) -> (i32, i32, i32) {
    %c0_i32 = arith.constant 0 : i32
    %c0_i32_0 = arith.constant 0 : i32
    %c0_i32_1 = arith.constant 0 : i32
    %c0_i32_2 = arith.constant 0 : i32
    return %c0_i32, %c0_i32_0, %c0_i32_1 : i32, i32, i32
  }
  func.func @transform_5(%arg0: i32) -> (i32, i32, i32) {
    %c0_i32 = arith.constant 0 : i32
    %c0_i32_0 = arith.constant 0 : i32
    %c0_i32_1 = arith.constant 0 : i32
    %c0_i32_2 = arith.constant 0 : i32
    return %c0_i32, %c0_i32_0, %c0_i32_1 : i32, i32, i32
  }
  func.func @transform_6(%arg0: i32) -> (i32, i32, i32) {
    %c0_i32 = arith.constant 0 : i32
    %c0_i32_0 = arith.constant 0 : i32
    %c0_i32_1 = arith.constant 0 : i32
    %c0_i32_2 = arith.constant 0 : i32
    return %c0_i32, %c0_i32_0, %c0_i32_1 : i32, i32, i32
  }
  func.func @transform_7(%arg0: i32) -> (i32, i32, i32) {
    %c0_i32 = arith.constant 0 : i32
    %c0_i32_0 = arith.constant 0 : i32
    %c0_i32_1 = arith.constant 0 : i32
    %c0_i32_2 = arith.constant 0 : i32
    return %c0_i32, %c0_i32_0, %c0_i32_1 : i32, i32, i32
  }
  func.func @transform_8(%arg0: i32) -> (i32, i32, i32) {
    %c0_i32 = arith.constant 0 : i32
    %c0_i32_0 = arith.constant 0 : i32
    %c0_i32_1 = arith.constant 0 : i32
    %c0_i32_2 = arith.constant 0 : i32
    return %c0_i32, %c0_i32_0, %c0_i32_1 : i32, i32, i32
  }
  func.func @transform_9(%arg0: i32) -> (i32, i32, i32) {
    %c0_i32 = arith.constant 0 : i32
    %c0_i32_0 = arith.constant 0 : i32
    %c0_i32_1 = arith.constant 0 : i32
    %c0_i32_2 = arith.constant 0 : i32
    return %c0_i32, %c0_i32_0, %c0_i32_1 : i32, i32, i32
  }
  func.func @transform_10(%arg0: i32) -> (i32, i32, i32) {
    %c0_i32 = arith.constant 0 : i32
    %c0_i32_0 = arith.constant 0 : i32
    %c0_i32_1 = arith.constant 0 : i32
    %c0_i32_2 = arith.constant 0 : i32
    return %c0_i32, %c0_i32_0, %c0_i32_1 : i32, i32, i32
  }
  func.func @transform_11(%arg0: i32) -> (i32, i32, i32) {
    %c0_i32 = arith.constant 0 : i32
    %c0_i32_0 = arith.constant 0 : i32
    %c0_i32_1 = arith.constant 0 : i32
    %c0_i32_2 = arith.constant 0 : i32
    return %c0_i32, %c0_i32_0, %c0_i32_1 : i32, i32, i32
  }
  func.func @transform_12(%arg0: i32) -> (i32, i32, i32) {
    %c0_i32 = arith.constant 0 : i32
    %c0_i32_0 = arith.constant 0 : i32
    %c0_i32_1 = arith.constant 0 : i32
    %c0_i32_2 = arith.constant 0 : i32
    return %c0_i32, %c0_i32_0, %c0_i32_1 : i32, i32, i32
  }
  func.func @transform_13(%arg0: i32) -> (i32, i32, i32) {
    %c0_i32 = arith.constant 0 : i32
    %c0_i32_0 = arith.constant 0 : i32
    %c0_i32_1 = arith.constant 0 : i32
    %c0_i32_2 = arith.constant 0 : i32
    return %c0_i32, %c0_i32_0, %c0_i32_1 : i32, i32, i32
  }
  func.func @transform_14(%arg0: i32) -> (i32, i32, i32) {
    %c0_i32 = arith.constant 0 : i32
    %c0_i32_0 = arith.constant 0 : i32
    %c0_i32_1 = arith.constant 0 : i32
    return %arg0, %c0_i32, %c0_i32_0 : i32, i32, i32
  }
}

</mosaic_0001>

<bundles_post_ra>
// kernel: tpu_custom_call.1
= control target key start
LH: loop header
LB: loop body
LE: loop exit
PB: predicated region body
PF: predicated region fallthrough
CT: control target
= control target key end

     0   :  { %s4132_s0 = inlined_call_operand.hbm [shape: f32[2,8,32], index: 0, kind: input, shape index: {}]   ;;  %s4133_s1 = inlined_call_operand.hbm [shape: f32[2,1,8], index: 1, kind: input, shape index: {}]   ;;  %s4134_s2 = inlined_call_operand.vmem [shape: f32[2,32,96], index: 2, kind: input, shape index: {}]   ;;  %s4135_s3 = inlined_call_operand.vmem [shape: f32[2,1,96], index: 3, kind: input, shape index: {}]   ;;  %s4136_s4 = inlined_call_operand.vmem [shape: f32[2,32,32], index: 4, kind: input, shape index: {}]   ;;  %s4137_s5 = inlined_call_operand.hbm [shape: f32[2,1,32], index: 5, kind: input, shape index: {}]   ;;  %s4138_s6 = inlined_call_operand.vmem [shape: f32[2,1,32], index: 6, kind: input, shape index: {}]   ;;  %s4139_s7 = inlined_call_operand.hbm [shape: f32[2,1,32], index: 7, kind: input, shape index: {}]   ;;  %s4140_s8 = inlined_call_operand.vmem [shape: f32[2,32,64], index: 8, kind: input, shape index: {}]   ;;  %s4141_s9 = inlined_call_operand.vmem [shape: f32[2,1,64], index: 9, kind: input, shape index: {}]   ;;  %s4142_s10 = inlined_call_operand.vmem [shape: f32[2,64,32], index: 10, kind: input, shape index: {}]   ;;  %s4143_s11 = inlined_call_operand.vmem [shape: f32[2,1,32], index: 11, kind: input, shape index: {}]   ;;  %s4144_s12 = inlined_call_operand.vmem [shape: f32[2,1,32], index: 12, kind: input, shape index: {}]   ;;  %s4145_s13 = inlined_call_operand.hbm [shape: f32[2,1,32], index: 13, kind: input, shape index: {}]   ;;  %s4146_s14 = inlined_call_operand.hbm [shape: f32[2,8,32], index: 14, kind: output, shape index: {}]  }
   0x1   :  { %4159 = sst [smem:[#allocation24_spill]] %s4137_s5 }
   0x2   :  { %4160 = sst [smem:[#allocation25_spill]] %s4139_s7 }
   0x3   :  { %4161 = sst [smem:[#allocation26_spill]] %s4142_s10 }
   0x4   :  { %4162 = sst [smem:[#allocation27_spill]] %s4143_s11 }
   0x5   :  { %4163 = sst [smem:[#allocation28_spill]] %s4145_s13 }
   0x6   :  { %4164 = sst [smem:[#allocation29_spill]] %s4146_s14 }
   0x7   :  { %19 = vsyncpa [#allocation3], 0 }
   0x8   :  { %21 = vsyncpa [#allocation3 + $0x1], 0 }
   0x9   :  { %22 = vsyncpa [#allocation6], 0 }
   0xa   :  { %24 = vsyncpa [#allocation6 + $0x1], 0 }
   0xb   :  { %25 = vsyncpa [#allocation9], 0 }
   0xc   :  { %26 = vsyncpa [#allocation4], 0 }
   0xd   :  { %28 = vsyncpa [#allocation4 + $0x1], 0  ;;  %s3260_s29 = smov 0   ;;  %s3262_s30 = smov 0  }
   0xe   :  { %s3264_s15 = smov 0   ;;  %s3266_s16 = smov 0  }
   0xf LB: > { %4165 = sst [smem:[#allocation17_spill]] %s3155_s29  ;;  %s3284_s20 = sadd.s32 4294967295, %s3167_s16   ;;  %s3167_s16 = sphi %s3266_s16, %s4191_s16   ;;  %s3163_s15 = sphi %s3264_s15, %s4193_s15   ;;  %s3159_s30 = sphi %s3262_s30, %s4195_s30   ;;  %s3155_s29 = sphi %s3260_s29, %s4194_s29  }
  0x10   : > { %4166 = sst [smem:[#allocation18_spill]] %s3163_s15  ;;  %p2684_p0 = scmp.ge.s32.totalorder %s3167_s16, 1 }
  0x11   : > { %4167 = sst [smem:[#allocation19_spill]] %s3167_s16  ;;  %p55_p1 = scmp.eq.s32.totalorder %s3284_s20, 0 }
  0x12   : > { %s4168_s5 = sld [smem:[#allocation24_spill]]  ;;  %p369_p2 = scmp.lt.s32.totalorder %s3167_s16, 3 }
  0x13   : > { %s3169_s22 = smov [#allocation7]   ;;  %s4170_s7 = sld [smem:[#allocation25_spill]] }
  0x14   : > { %p3289_p3 = pnand %p2684_p0, %p369_p2  ;;  %s391_s23 = sshll.u32 %s3169_s22, 4  ;;  %s392_s23 = int_to_ptr.vmem [resolvable:$true] %s391_s23 }
  0x15   : > { %s4172_s13 = sld [smem:[#allocation28_spill]]  ;;  %s3170_s22 = smov [#allocation8]  }
  0x16   : > { %p2778_p4 = pneg %p3289_p3  ;;  %s408_s24 = sshll.u32 %s3170_s22, 4  ;;  %s409_s24 = int_to_ptr.vmem [resolvable:$true] %s408_s24 }
  0x17   : > { %s3171_s25 = smov 16   ;;  %s3173_s28 = smov [#allocation10]  }
  0x18   : > { %s389_s19 = sshll.u32 %s4168_s5, 4  ;;  %p3301_p6 = pnand %p2778_p4, %p55_p1  ;;  %s390_s19 = int_to_ptr.hbm [resolvable:$true] %s389_s19 }
  0x19   : > { %s406_s26 = sshll.u32 %s4170_s7, 4  ;;  %s3172_s5 = smov 1   ;;  %s407_s26 = int_to_ptr.hbm [resolvable:$true] %s406_s26 }
  0x1a   : > { %2781 = dma.hbm_to_vmem [thread:$0]  (!%p3301_p6), %s390_s19, 32, %s392_s23, [#allocation6], %s3171_s25, %s3171_s25, %s3172_s5  }
  0x1b   : > { %s435_s18 = sshll.u32 %s4172_s13, 4  ;;  %s437_s17 = sshll.u32 %s3173_s28, 4  ;;  %s436_s18 = int_to_ptr.hbm [resolvable:$true] %s435_s18  ;;  %s438_s17 = int_to_ptr.vmem [resolvable:$true] %s437_s17 }
  0x1c   : > { %2784 = dma.hbm_to_vmem [thread:$0]  (!%p3301_p6), %s407_s26, 32, %s409_s24, [#allocation9], %s3171_s25, %s3171_s25, %s3172_s5  }
  0x1d   : > { %2787 = dma.hbm_to_vmem [thread:$0]  (!%p3301_p6), %s436_s18, 32, %s438_s17, [#allocation9], %s3171_s25, %s3171_s25, %s3172_s5  }
  0x1e   : > { %s2683_s22 = sadd.s32 4294967294, %s3167_s16   ;;  %s3316_s7 = sadd.s32 1, %s3167_s16  }
  0x1f   : > { %4173 = sst [smem:[#allocation20_spill]] %s3316_s7  ;;  %s41_s13 = sadd.s32 1, %s3163_s15 }
  0x20   : > { %s38_s19 = ssub.s32 %s3167_s16, %s3316_s7  ;;  %p48_p7 = scmp.ne.s32.totalorder %s3163_s15, %s3159_s30 }
  0x21   : > { %p39_p8 = scmp.eq.s32.totalorder %s38_s19, 0  ;;  %p49_p9 = scmp.eq.s32.totalorder %s3167_s16, 0 }
  0x22   : > { %p54_p10 = scmp.ne.s32.totalorder %s3159_s30, %s3155_s29  ;;  %p356_p11 = scmp.eq.s32.totalorder %s3284_s20, 1 }
  0x23   : > { %s3328_s23 = scalar_select %p39_p8, %s3163_s15, %s41_s13  }
  0x24   : > { %p3330_p12 = por %p49_p9, %p48_p7  ;;  %p3336_p13 = por %p55_p1, %p54_p10 }
  0x25   : > { %4174 = sst [smem:[#allocation21_spill]] %s3328_s23  ;;  %p3340_p0 = por %p356_p11, %p48_p7 }
  0x26   : > { %p362_p2 = scmp.eq.s32.totalorder %s2683_s22, 1  ;;  %p2802_p4 = scmp.lt.s32.totalorder %s3167_s16, 2 }
  0x27   : > { %s4177_s27 = scalar_select %p3340_p0, 1, 0 }
  0x28   : > { %s3346_s13 = sand.u32 1, %s3163_s15   ;;  %p3348_p6 = por %p362_p2, %p54_p10 }
  0x29   : > { %4178 = sst [smem:[#allocation22_spill]] %s4177_s27  ;;  %s2689_s24 = sshll.u32 %s3346_s13, 3 }
  0x2a   : > { %s4179_s18 = scalar_select %p3348_p6, 1, 0 }
  0x2b   : > { %s2690_s25 = sshll.u32 %s3167_s16, 3  ;;  %s455_s7 = scalar_lea.vmem [#allocation2], %s2689_s24 }
  0x2c   : > { %4180 = sst [smem:[#allocation23_spill]] %s4179_s18  ;;  %s459_s19 = scalar_lea.hbm %s4132_s0, %s2690_s25 }
  0x2d   : > { %s461_s23 = sshll.u32 %s459_s19, 4  ;;  %s463_s29 = sshll.u32 %s455_s7, 4  ;;  %s462_s23 = int_to_ptr.hbm [resolvable:$true] %s461_s23  ;;  %s464_s29 = int_to_ptr.vmem [resolvable:$true] %s463_s29 }
  0x2e   : > { %p3359_p7 = pnand %p2802_p4, %p3330_p12  ;;  %s470_s15 = sand.u32 1, %s3167_s16  }
  0x2f   : > { %s476_s14 = scalar_lea.hbm %s4133_s1, %s3167_s16  ;;  %s452_s11 = scalar_lea.sflag [#allocation3], %s3346_s13 }
  0x30   : > { %s3029_s28 = sshra.s32 %s462_s23, 4  ;;  %p3033_p9 = pneg %p3359_p7  ;;  %s3030_s28 = int_to_ptr.hbm [resolvable:$true] %s3029_s28 }
  0x31   : > { %s3031_s25 = scalar_lea.hbm %s3030_s28, 8  ;;  %s3036_s24 = scalar_lea.hbm %s4132_s0, 16 }
  0x32   : > { %p3032_p8 = scmp.ne.s32.totalorder %s3030_s28, %s3031_s25  ;;  %p3037_p12 = scmp.lt.s32.totalorder %s3030_s28, %s4132_s0 }
  0x33   : > { %p3038_p2 = scmp.lt.s32.totalorder %s3036_s24, %s3031_s25 }
  0x34   : > { %p3034_p10 = pnand %p3033_p9, %p3032_p8 }
  0x35   : > { %p3039_p4 = por %p3038_p2, %p3037_p12 }
  0x36   : > { %p3035_p11 = pneg %p3034_p10 }
  0x38   : > { %p3040_p5 = pnand %p3039_p4, %p3035_p11 }
  0x3a   : > { %3043 = shalt.err (!%p3040_p5)
}
  0x3b   : > { %2791 = dma.hbm_to_vmem [thread:$0]  (!%p3359_p7), %s462_s23, 128, %s464_s29, %s452_s11  }
  0x3c   : > { %s478_s27 = sshll.u32 %s476_s14, 4  ;;  %s473_s18 = scalar_lea.vmem [#allocation5], %s3346_s13  ;;  %s479_s27 = int_to_ptr.hbm [resolvable:$true] %s478_s27 }
  0x3d   : > { %s480_s16 = sshll.u32 %s473_s18, 4  ;;  %s471_s7 = scalar_lea.sflag [#allocation6], %s470_s15  ;;  %s481_s16 = int_to_ptr.vmem [resolvable:$true] %s480_s16 }
  0x3e   : > { %s3059_s26 = sshra.s32 %s479_s27, 4  ;;  %s3066_s24 = scalar_lea.hbm %s4133_s1, 2  ;;  %s3060_s26 = int_to_ptr.hbm [resolvable:$true] %s3059_s26 }
  0x3f   : > { %s3061_s10 = scalar_lea.hbm %s3060_s26, 1  ;;  %p3067_p5 = scmp.lt.s32.totalorder %s3060_s26, %s4133_s1 }
  0x40   : > { %p3062_p8 = scmp.ne.s32.totalorder %s3060_s26, %s3061_s10  ;;  %p3068_p12 = scmp.lt.s32.totalorder %s3066_s24, %s3061_s10 }
  0x42   : > { %p3064_p10 = pnand %p3062_p8, %p3033_p9  ;;  %p3069_p2 = por %p3068_p12, %p3067_p5 }
  0x44   : > { %p3065_p11 = pneg %p3064_p10 }
  0x46   : > { %p3070_p4 = pnand %p3069_p2, %p3065_p11 }
  0x48   : > { %3073 = shalt.err (!%p3070_p4)
}
  0x49   : > { %2794 = dma.hbm_to_vmem [thread:$0]  (!%p3359_p7), %s479_s27, 16, %s481_s16, %s471_s7  }
  0x4a   : > { %489 = sbr.rel (%p3289_p3) target bundleno = 4208 (0x1070), region = 76  ;;  %s3397_s14 = sand.u32 (!%p3289_p3), 1, %s3159_s30  }
  0x4b   : > { %s4158_s29 = sshll.u32 (!%p3289_p3), %s3397_s14, 3  ;;  %s492_s15 = scalar_lea.sflag (!%p3289_p3), [#allocation3], %s3397_s14 }
  0x4c   : > { %s495_s10 = scalar_lea.vmem (!%p3289_p3), [#allocation2], %s4158_s29 }
  0x4f   : > { %3134 = dma.done.wait (%p3336_p13), %s492_s15, 128  }
  0x50   : > { %3136 = vsyncadd (%p3336_p13), %s492_s15, 4294967168  ;;  %s501_s16 = sand.u32 1, %s3284_s20   ;;  %s504_s23 = scalar_lea.vmem [#allocation5], %s3397_s14 }
  0x51   : > { %s502_s21 = scalar_lea.sflag [#allocation6], %s501_s16 }
  0x52   : > { %3138 = dma.done.wait (%p3336_p13), %s502_s21, 16  }
  0x53   : > { %3140 = vsyncadd (%p3336_p13), %s502_s21, 4294967280 }
  0x54   : > { %3142 = dma.done.wait (%p55_p1), [#allocation6], 32  }
  0x55   : > { %3144 = vsyncadd (%p55_p1), [#allocation6], 4294967264 }
  0x56   : > { %3146 = dma.done.wait (%p55_p1), [#allocation9], 64  }
  0x57   : > { %3148 = vsyncadd (%p55_p1), [#allocation9], 4294967232  ;;  %vm573_vm0 = vcmask 261120   ;;  %v3421_v0 = vld [vmem:[%s495_s10] sm:$0xff]  ;;  %v3174_v2 = vmov 32.0   ;;  %v614_v14 = vld [vmem:[%s4134_s2 + $0x18] sm:$0xff] }
  0x58   : > { %v574_v1 = vsel %vm573_vm0, %v3421_v0, 0.0  ;;  %2892 = vrcp.f32 %v3174_v2  ;;  %634 = vmatpush.msra.mxu0 %v614_v14  ;;  %v613_v15 = vld [vmem:[%s4134_s2 + $0x10] sm:$0xff]  ;;  %v612_v16 = vld [vmem:[%s4134_s2 + $0x8] sm:$0xff]  ;;  %v611_v17 = vld [vmem:[%s4134_s2] sm:$0xff]  ;;  %s3175_s11 = smov 104   ;;  %s3176_s15 = smov 120  }
  0x59   : > { %575 = vadd.xlane.f32.xlu0 %v574_v1  ;;  %v2875_v27 = vld [vmem:[%s4138_s6] ss:$0 sm:$0xff]  ;;  %v2876_v30 = vld [vmem:[#allocation8] ss:$0 sm:$0xff]  ;;  %s3177_s10 = smov 96   ;;  %s3178_s16 = smov 112  }
  0x5a   : > { %635 = vmatpush.msra.mxu0 %v613_v15  ;;  %v2877_v33 = vld [vmem:[%s4135_s3] ss:$0 sm:$0xff]  ;;  %v3179_v44 = vmov 1983009808   ;;  %vm654_vm5 = vcmask 1047556   ;;  %vm1018_vm6 = vcmask 64512  }
  0x5b   : > { %v659_v45 = vunpack.c.l.s4 %v3179_v44  ;;  %v3180_v53 = vmov 1934713408   ;;  %s3181_s21 = smov 64   ;;  %s3182_s5 = smov 16   ;;  %vm1382_vm7 = vcmask 130048   ;;  %vm1384_vm8 = vcmask 195584  }
  0x5c   : > { %636 = vmatpush.msra.mxu0 %v612_v16  ;;  %v683_v54 = vunpack.c.l.s4 %v3180_v53  ;;  %s3183_s13 = smov 8   ;;  %s3184_s22 = smov 24  }
  0x5d   : > { %v3479_v50 = vunpack.c.0.s8 %v659_v45  ;;  %s4182_s26 = sld [smem:[#allocation26_spill]]  ;;  %s4186_s27 = sshll.u32 %s3397_s14, 3 }
  0x5e   : > { %v2893_v3 = vpop.eup %2892  ;;  %637 = vmatpush.msra.mxu0 %v611_v17  ;;  %v3484_v61 = vunpack.c.0.s8 %v683_v54  ;;  %s4183_s28 = sld [smem:[#allocation27_spill]]  ;;  %s568_s18 = scalar_lea.vmem [#allocation11], %s4186_s27 }
  0x5f   : > { %v578_v4 = vmul.f32 32.0, %v2893_v3  ;;  %vm582_vm1 = vweird.f32 %v2893_v3  ;;  %s2563_s7 = sshll.u32 %s568_s18, 4  ;;  %s2564_s7 = int_to_ptr.vmem [resolvable:$true] %s2563_s7 }
  0x61   : > { %v579_v5 = vsub.f32 1.0, %v578_v4 }
  0x63   : > { %v580_v6 = vmul.f32 %v2893_v3, %v579_v5 }
  0x65   : > { %v581_v7 = vadd.f32 %v2893_v3, %v580_v6 }
  0x67   : > { %v3425_v8 = vsel %vm582_vm1, %v2893_v3, %v581_v7  ;;  %vm1537_vm1 = vcmask 523264  }
  0xcc   : > { %v576_v9 = vpop.xlane.xlu0 %575 }
  0xcd   : > { %v584_v10 = vmul.f32 %v3425_v8, %v576_v9 }
  0xcf   : > { %v585_v11 = vsub.f32 %v3421_v0, %v584_v10 }
  0xd1   : > { %v586_v12 = vmul.f32 %v585_v11, %v585_v11 }
  0xd3   : > { %v587_v13 = vsel %vm573_vm0, %v586_v12, 0.0 }
  0xd4   : > { %588 = vadd.xlane.f32.xlu0 %v587_v13 }
 0x147   : > { %v589_v18 = vpop.xlane.xlu0 %588 }
 0x148   : > { %v590_v19 = vmul.f32 %v589_v18, %v3425_v8 }
 0x14a   : > { %v591_v20 = vadd.f32 1e-06, %v590_v19 }
 0x14c   : > { %2894 = vrsqrt.f32 %v591_v20  ;;  %vm598_vm3 = vweird.f32 %v591_v20 }
 0x152   : > { %v2895_v21 = vpop.eup %2894 }
 0x153   : > { %v593_v22 = vmul.f32 %v2895_v21, %v591_v20  ;;  %vm599_vm2 = vweird.f32 %v2895_v21 }
 0x154   : > { %vm600_vm4 = vmor %vm598_vm3, %vm599_vm2 }
 0x155   : > { %v594_v23 = vmul.f32 %v2895_v21, %v593_v22 }
 0x157   : > { %v595_v24 = vmul.f32 0.5, %v594_v23 }
 0x159   : > { %v596_v25 = vsub.f32 1.5, %v595_v24 }
 0x15b   : > { %v597_v26 = vmul.f32 %v2895_v21, %v596_v25 }
 0x15d   : > { %v601_v28 = vsel %vm600_vm4, %v2895_v21, %v597_v26 }
 0x15e   : > { %v602_v29 = vmul.f32 %v601_v28, %v585_v11 }
 0x160   : > { %v606_v31 = vmul.f32 %v2875_v27, %v602_v29 }
 0x162   : > { %v610_v32 = vadd.f32 %v2876_v30, %v606_v31 }
 0x164   : > { %2697 = vmatmul.msk.f32.vlgmr.msra.gmra.mxu0 %vm573_vm0, %v610_v32 }
 0x1e1   : > { %v639_v34 = vpop.f32.mrf.mxu0 }
 0x1e2   : > { %v3450_v35 = vadd.f32 %v2877_v33, %v639_v34 }
 0x1e4   : > { %769 = vrot.lane.b32.xlu2 %v3450_v35, %s3175_s11  ;;  %765 = vrot.lane.b32.xlu1 %v3450_v35, %s3176_s15  ;;  %v642_v36 = vmul.f32 0.35355338, %v3450_v35 }
 0x1e6   : > { %v656_v58 = vrot.slane %v642_v36, 4 }
 0x1ec   : > { %771 = vrot.lane.b32.xlu2 %v3450_v35, %s3177_s10  ;;  %767 = vrot.lane.b32.xlu1 %v3450_v35, %s3178_s16 }
 0x1f4   : > { %644 = vrot.lane.b32.xlu1 %v642_v36, %s3176_s15 }
 0x23e   : > { %v3462_v37 = vpop.permute.xlu2 %769 }
 0x23f   : > { %777 = vrot.lane.b32.xlu2 %v3462_v37, %s3177_s10 }
 0x246   : > { %v772_v41 = vpop.permute.xlu2 %771 }
 0x247   : > { %647 = vrot.lane.b32.xlu2 %v642_v36, %s3178_s16  ;;  %v785_v56 = vrot.slane %v772_v41, 4 }
 0x256   : > { %v3467_v38 = vpop.permute.xlu1 %765 }
 0x257   : > { %773 = vrot.lane.b32.xlu0 %v3467_v38, %s3177_s10 }
 0x25e   : > { %v3471_v39 = vpop.permute.xlu1 %767 }
 0x25f   : > { %v2860_v40 = vpack.i.bf16 %v3462_v37, %v3471_v39  ;;  %775 = vrot.lane.b32.xlu1 %v3471_v39, %s3177_s10 }
 0x266   : > { %v645_v43 = vpop.permute.xlu1 %644 }
 0x267   : > { %650 = vrot.lane.b32.xlu1 %v642_v36, %s3175_s11  ;;  %v668_v20 = vrot.slane %v645_v43, 4 }
 0x299   : > { %v778_v42 = vpop.permute.xlu2 %777 }
 0x29a   : > { %v795_v48 = vrot.slane %v778_v42, 4 }
 0x2a1   : > { %v648_v51 = vpop.permute.xlu2 %647 }
 0x2a2   : > { %v653_v57 = vrot.slane %v648_v51, 4  ;;  %v657_v1 = vsel %vm654_vm5, %v648_v51, %v656_v58 }
 0x2a3   : > { %v665_v11 = vperm.slane %v657_v1, %v3479_v50 }
 0x2a4   : > { %v655_v4 = vsel %vm654_vm5, %v653_v57, %v642_v36 }
 0x2a5   : > { %v661_v13 = vperm.slane %v655_v4, %v3479_v50  ;;  %v692_v23 = vrot.slane %v665_v11, 4 }
 0x2a7   : > { %v680_v27 = vrot.slane %v661_v13, 4 }
 0x2c9   : > { %v774_v46 = vpop.permute.xlu0 %773 }
 0x2ca   : > { %v797_v47 = vrot.slane %v774_v46, 4  ;;  %v796_v52 = vsel %vm654_vm5, %v795_v48, %v774_v46 }
 0x2cb   : > { %v802_v59 = vperm.slane %v796_v52, %v3479_v50 }
 0x2cc   : > { %v798_v49 = vsel %vm654_vm5, %v778_v42, %v797_v47 }
 0x2cd   : > { %v806_v55 = vperm.slane %v798_v49, %v3479_v50  ;;  %v807_v6 = vrot.slane %v802_v59, 4 }
 0x2cf   : > { %v819_v2 = vrot.slane %v806_v55, 4 }
 0x2d1   : > { %v776_v60 = vpop.permute.xlu1 %775 }
 0x2d2   : > { %v783_v62 = vrot.slane %v776_v60, 4  ;;  %v786_v63 = vsel %vm654_vm5, %v776_v60, %v785_v56 }
 0x2d3   : > { %v794_v3 = vperm.slane %v786_v63, %v3479_v50 }
 0x2d4   : > { %v784_v5 = vsel %vm654_vm5, %v783_v62, %v772_v41 }
 0x2d5   : > { %v790_v7 = vperm.slane %v784_v5, %v3479_v50  ;;  %v820_v9 = vsel %vm654_vm5, %v819_v2, %v794_v3  ;;  %v821_v10 = vrot.slane %v794_v3, 4 }
 0x2d6   : > { %v826_v12 = vperm.slane %v820_v9, %v3484_v61 }
 0x2d7   : > { %v808_v14 = vsel %vm654_vm5, %v807_v6, %v790_v7  ;;  %v809_v15 = vrot.slane %v790_v7, 4  ;;  %v822_v16 = vsel %vm654_vm5, %v806_v55, %v821_v10 }
 0x2d8   : > { %v814_v17 = vperm.slane %v808_v14, %v3484_v61  ;;  %v830_v18 = vperm.slane %v822_v16, %v3484_v61  ;;  %v835_v19 = vrot.slane %v826_v12, 4 }
 0x2d9   : > { %v810_v21 = vsel %vm654_vm5, %v802_v59, %v809_v15  ;;  %v651_v22 = vpop.permute.xlu1 %650 }
 0x2da   : > { %v818_v24 = vperm.slane %v810_v21, %v3484_v61  ;;  %v831_v25 = vrot.slane %v814_v17, 4  ;;  %v837_v26 = vrot.slane %v830_v18, 4  ;;  %v836_v28 = vsel %vm654_vm5, 0.0, %v835_v19 }
 0x2db   : > { %v666_v29 = vrot.slane %v651_v22, 4  ;;  %v669_v30 = vsel %vm654_vm5, %v651_v22, %v668_v20 }
 0x2dc   : > { %v833_v31 = vrot.slane %v818_v24, 4  ;;  %v838_v32 = vsel %vm654_vm5, 0.0, %v837_v26  ;;  %v850_v33 = vsel %vm654_vm5, %v837_v26, %v826_v12  ;;  %v677_v34 = vperm.slane %v669_v30, %v3479_v50 }
 0x2dd   : > { %v854_v36 = vperm.slane %v850_v33, %v3479_v50  ;;  %v855_v41 = vrot.slane %v838_v32, 4  ;;  %v667_v42 = vsel %vm654_vm5, %v666_v29, %v645_v43  ;;  %v832_v44 = vsel %vm654_vm5, 0.0, %v831_v25 }
 0x2de   : > { %v673_v45 = vperm.slane %v667_v42, %v3479_v50  ;;  %v690_v46 = vrot.slane %v677_v34, 4  ;;  %v693_v47 = vsel %vm654_vm5, %v677_v34, %v692_v23  ;;  %v834_v48 = vsel %vm654_vm5, 0.0, %v833_v31 }
 0x2df   : > { %v701_v49 = vperm.slane %v693_v47, %v3484_v61  ;;  %v839_v51 = vsel %vm654_vm5, %v833_v31, %v814_v17  ;;  %v844_v52 = vrot.slane %v834_v48, 4  ;;  %v856_v53 = vsel %vm654_vm5, %v855_v41, %v836_v28 }
 0x2e0   : > { %v678_v54 = vrot.slane %v673_v45, 4  ;;  %v681_v55 = vsel %vm654_vm5, %v673_v45, %v680_v27  ;;  %v691_v43 = vsel %vm654_vm5, %v690_v46, %v665_v11  ;;  %v843_v56 = vperm.slane %v839_v51, %v3479_v50 }
 0x2e1   : > { %v689_v57 = vperm.slane %v681_v55, %v3484_v61  ;;  %v697_v58 = vperm.slane %v691_v43, %v3484_v61  ;;  %v708_v59 = vrot.slane %v701_v49, 4  ;;  %v845_v60 = vsel %vm654_vm5, %v844_v52, %v832_v44 }
 0x2e2   : > { %v679_v62 = vsel %vm654_vm5, %v678_v54, %v661_v13  ;;  %v849_v63 = vperm.slane %v845_v60, %v3479_v50  ;;  %v860_v1 = vperm.slane %v856_v53, %v3479_v50  ;;  %v863_v2 = vrot.slane %v843_v56, 4 }
 0x2e3   : > { %v685_v3 = vperm.slane %v679_v62, %v3484_v61  ;;  %v704_v4 = vrot.slane %v689_v57, 4  ;;  %v706_v5 = vrot.slane %v697_v58, 4  ;;  %v709_v6 = vsel %vm654_vm5, 0.0, %v708_v59 }
 0x2e4   : > { %v721_v7 = vsel %vm654_vm5, %v708_v59, %v697_v58  ;;  %v726_v9 = vrot.slane %v709_v6, 4  ;;  %v864_v10 = vsel %vm654_vm5, %v849_v63, %v863_v2  ;;  %v875_v11 = vrot.slane %v854_v36, 4 }
 0x2e5   : > { %v702_v12 = vrot.slane %v685_v3, 4  ;;  %v705_v13 = vsel %vm654_vm5, 0.0, %v704_v4  ;;  %v707_v14 = vsel %vm654_vm5, 0.0, %v706_v5  ;;  %v725_v15 = vperm.slane %v721_v7, %v3479_v50  ;;  %v2878_v5 = vld [vmem:[%s504_s23] ss:$0 sm:$0xff] }
 0x2e6   : > { %v715_v16 = vrot.slane %v705_v13, 4  ;;  %v872_v17 = vperm.slane %v864_v10, %v3484_v61  ;;  %v876_v18 = vsel %vm654_vm5, %v860_v1, %v875_v11  ;;  %v861_v19 = vrot.slane %v849_v63, 4 }
 0x2e7   : > { %v884_v20 = vperm.slane %v876_v18, %v3484_v61  ;;  %v873_v21 = vrot.slane %v860_v1, 4  ;;  %v703_v22 = vsel %vm654_vm5, 0.0, %v702_v12  ;;  %v710_v23 = vsel %vm654_vm5, %v704_v4, %v685_v3 }
 0x2e8   : > { %v862_v24 = vsel %vm654_vm5, %v861_v19, %v843_v56  ;;  %v891_v25 = vrot.slane %v872_v17, 4  ;;  %v714_v26 = vperm.slane %v710_v23, %v3479_v50  ;;  %v716_v27 = vsel %vm654_vm5, %v715_v16, %v703_v22 }
 0x2e9   : > { %v889_v28 = vrot.slane %v884_v20, 4  ;;  %v868_v29 = vperm.slane %v862_v24, %v3484_v61  ;;  %v874_v30 = vsel %vm654_vm5, %v873_v21, %v854_v36  ;;  %v720_v31 = vperm.slane %v716_v27, %v3479_v50 }
 0x2ea   : > { %v880_v32 = vperm.slane %v874_v30, %v3484_v61  ;;  %v892_v33 = vsel %vm654_vm5, %v884_v20, %v891_v25  ;;  %v727_v34 = vsel %vm654_vm5, %v726_v9, %v707_v14  ;;  %v734_v41 = vrot.slane %v714_v26, 4 }
 0x2eb   : > { %v890_v42 = vsel %vm654_vm5, %v889_v28, %v872_v17  ;;  %2704 = vmatpush.xpose.msk.msra.mxu1 %vm1018_vm6, %v892_v33  ;;  %v887_v44 = vrot.slane %v868_v29, 4  ;;  %v731_v45 = vperm.slane %v727_v34, %v3479_v50  ;;  %v746_v46 = vrot.slane %v725_v15, 4 }
 0x2ec   : > { %2702 = vmatpush.xpose.msk.msra.mxu3 %vm1018_vm6, %v890_v42  ;;  %v885_v36 = vrot.slane %v880_v32, 4  ;;  %v735_v47 = vsel %vm654_vm5, %v720_v31, %v734_v41  ;;  %v732_v48 = vrot.slane %v720_v31, 4  ;;  %v2855_v19 = vpack.i.bf16 %v3467_v38, %v3450_v35 }
 0x2ed   : > { %v888_v49 = vsel %vm654_vm5, %v880_v32, %v887_v44  ;;  %v743_v51 = vperm.slane %v735_v47, %v3484_v61  ;;  %v747_v52 = vsel %vm654_vm5, %v731_v45, %v746_v46  ;;  %v744_v53 = vrot.slane %v731_v45, 4 }
 0x2ee   : > { %v886_v54 = vsel %vm654_vm5, %v885_v36, %v868_v29  ;;  %v755_v55 = vperm.slane %v747_v52, %v3484_v61  ;;  %v733_v43 = vsel %vm654_vm5, %v732_v48, %v714_v26 }
 0x2ef   : > { %2698 = vmatpush.xpose.msk.msra.mxu2 %vm1018_vm6, %v886_v54  ;;  %v745_v56 = vsel %vm654_vm5, %v744_v53, %v725_v15  ;;  %v762_v57 = vrot.slane %v743_v51, 4  ;;  %v739_v59 = vperm.slane %v733_v43, %v3484_v61 }
 0x2f0   : > { %v760_v58 = vrot.slane %v755_v55, 4  ;;  %v751_v60 = vperm.slane %v745_v56, %v3484_v61 }
 0x2f1   : > { %v763_v62 = vsel %vm654_vm5, %v755_v55, %v762_v57  ;;  %v758_v3 = vrot.slane %v739_v59, 4 }
 0x2f2   : > { %v761_v63 = vsel %vm654_vm5, %v760_v58, %v743_v51  ;;  %v756_v1 = vrot.slane %v751_v60, 4  ;;  %2705 = vmatmul.msk.f32.vlgmr.msra.gmra.mxu1 %vm1018_vm6, %v763_v62 }
 0x2f3   : > { %2700 = vmatpush.xpose.msk.msrb.mxu2 %vm1018_vm6, %v888_v49  ;;  %2703 = vmatmul.msk.f32.vlgmr.msra.gmra.mxu3 %vm1018_vm6, %v761_v63  ;;  %v759_v4 = vsel %vm654_vm5, %v751_v60, %v758_v3 }
 0x2f4   : > { %v757_v2 = vsel %vm654_vm5, %v756_v1, %v739_v59 }
 0x2f5   : > { %2699 = vmatmul.msk.f32.vlgmr.msra.gmra.mxu2 %vm1018_vm6, %v757_v2 }
 0x2fd   : > { %2701 = vmatmul.msk.f32.vlgmr.msrb.gmra.mxu2 %vm1018_vm6, %v759_v4 }
 0x36f   : > { %v1120_v6 = vpop.f32.mrf.mxu1 }
 0x370   : > { %v1121_v7 = vadd.f32 %v2878_v5, %v1120_v6 }
 0x372   : > { %v1132_v9 = vsel %vm1018_vm6, %v1121_v7, -inf }
 0x373   : > { %1133 = vmax.xlane.f32.xlu2 %v1132_v9 }
 0x376   : > { %v1094_v10 = vpop.f32.mrf.mxu3 }
 0x377   : > { %v1095_v11 = vadd.f32 %v2878_v5, %v1094_v10 }
 0x378   : > { %v1042_v12 = vpop.f32.mrf.mxu2 }
 0x379   : > { %v1043_v13 = vadd.f32 %v2878_v5, %v1042_v12  ;;  %v1129_v14 = vsel %vm1018_vm6, %v1095_v11, -inf }
 0x37a   : > { %1130 = vmax.xlane.f32.xlu1 %v1129_v14 }
 0x37b   : > { %v1123_v15 = vsel %vm1018_vm6, %v1043_v13, -inf }
 0x37c   : > { %1124 = vmax.xlane.f32.xlu2 %v1123_v15 }
 0x380   : > { %v1068_v16 = vpop.f32.mrf.mxu2 }
 0x381   : > { %v1069_v17 = vadd.f32 %v2878_v5, %v1068_v16 }
 0x383   : > { %v1126_v18 = vsel %vm1018_vm6, %v1069_v17, -inf }
 0x384   : > { %1127 = vmax.xlane.f32.xlu0 %v1126_v18 }
 0x394   : > { %2861 = vrot.lane.b32.xlu2 %v2860_v40, %s3181_s21 }
 0x398   : > { %2856 = vrot.lane.b32.xlu0 %v2855_v19, %s3181_s21 }
 0x3e6   : > { %v1134_v20 = vpop.xlane.xlu2 %1133 }
 0x3e7   : > { %v1138_v37 = vsub.f32 %v1121_v7, %v1134_v20 }
 0x3e9   : > { %v1145_v30 = vmul.f32 1.442695, %v1138_v37 }
 0x3ed   : > { %v1131_v21 = vpop.xlane.xlu1 %1130 }
 0x3ee   : > { %v1137_v22 = vsub.f32 %v1095_v11, %v1131_v21 }
 0x3ef   : > { %v1125_v23 = vpop.xlane.xlu2 %1124 }
 0x3f0   : > { %v1143_v24 = vmul.f32 1.442695, %v1137_v22  ;;  %v1135_v25 = vsub.f32 %v1043_v13, %v1125_v23 }
 0x3f2   : > { %2896 = vpow2.f32 %v1143_v24  ;;  %v1139_v26 = vmul.f32 1.442695, %v1135_v25 }
 0x3f4   : > { %2898 = vpow2.f32 %v1139_v26 }
 0x3f7   : > { %v1128_v27 = vpop.xlane.xlu0 %1127  ;;  %v2862_v33 = vpop.permute.xlu2 %2861 }
 0x3f8   : > { %v3583_v28 = vpop.eup %2896  ;;  %v1136_v29 = vsub.f32 %v1069_v17, %v1128_v27  ;;  %v2864_v41 = vunpack.i.h.bf16 %v2862_v33  ;;  %v2863_v42 = vunpack.i.l.bf16 %v2862_v33 }
 0x3f9   : > { %v1153_v39 = vsel %vm1018_vm6, %v3583_v28, 0.0 }
 0x3fa   : > { %v3587_v35 = vpop.eup %2898  ;;  %v1141_v38 = vmul.f32 1.442695, %v1136_v29  ;;  %1154 = vadd.xlane.f32.xlu0 %v1153_v39  ;;  %v917_v46 = vrot.slane %v2864_v41, 4  ;;  %v905_v36 = vrot.slane %v2863_v42, 4 }
 0x3fb   : > { %v1147_v40 = vsel %vm1018_vm6, %v3587_v35, 0.0 }
 0x3fc   : > { %2900 = vpow2.f32 %v1141_v38  ;;  %1148 = vadd.xlane.f32.xlu1 %v1147_v40 }
 0x3fd   : > { %2902 = vpow2.f32 %v1145_v30 }
 0x402   : > { %v3591_v31 = vpop.eup %2900 }
 0x403   : > { %v1150_v32 = vsel %vm1018_vm6, %v3591_v31, 0.0  ;;  %v3595_v34 = vpop.eup %2902 }
 0x404   : > { %1151 = vadd.xlane.f32.xlu1 %v1150_v32  ;;  %v1156_v45 = vsel %vm1018_vm6, %v3595_v34, 0.0 }
 0x40a   : > { %v2857_v44 = vpop.permute.xlu0 %2856 }
 0x40b   : > { %v2859_v47 = vunpack.i.h.bf16 %v2857_v44  ;;  %v2858_v48 = vunpack.i.l.bf16 %v2857_v44 }
 0x40c   : > { %1157 = vadd.xlane.f32.xlu1 %v1156_v45 }
 0x40d   : > { %v919_v49 = vrot.slane %v2859_v47, 4  ;;  %v906_v51 = vsel %vm654_vm5, %v905_v36, %v2858_v48  ;;  %v907_v52 = vrot.slane %v2858_v48, 4  ;;  %v918_v53 = vsel %vm654_vm5, %v917_v46, %v2859_v47 }
 0x40e   : > { %v912_v54 = vperm.slane %v906_v51, %v3479_v50  ;;  %v924_v55 = vperm.slane %v918_v53, %v3479_v50 }
 0x40f   : > { %v908_v43 = vsel %vm654_vm5, %v2863_v42, %v907_v52  ;;  %v920_v56 = vsel %vm654_vm5, %v2864_v41, %v919_v49 }
 0x410   : > { %v916_v57 = vperm.slane %v908_v43, %v3479_v50  ;;  %v928_v58 = vperm.slane %v920_v56, %v3479_v50  ;;  %v929_v59 = vrot.slane %v924_v55, 4  ;;  %v931_v60 = vrot.slane %v912_v54, 4 }
 0x412   : > { %v930_v62 = vsel %vm654_vm5, %v929_v59, %v912_v54  ;;  %v932_v63 = vsel %vm654_vm5, %v924_v55, %v931_v60  ;;  %v941_v1 = vrot.slane %v928_v58, 4  ;;  %v943_v2 = vrot.slane %v916_v57, 4 }
 0x413   : > { %v936_v3 = vperm.slane %v930_v62, %v3484_v61  ;;  %v940_v4 = vperm.slane %v932_v63, %v3484_v61 }
 0x414   : > { %v942_v5 = vsel %vm654_vm5, %v941_v1, %v916_v57  ;;  %v944_v6 = vsel %vm654_vm5, %v928_v58, %v943_v2 }
 0x415   : > { %v948_v7 = vperm.slane %v942_v5, %v3484_v61  ;;  %v952_v9 = vperm.slane %v944_v6, %v3484_v61  ;;  %v953_v10 = vrot.slane %v936_v3, 4  ;;  %v955_v11 = vrot.slane %v940_v4, 4 }
 0x417   : > { %v956_v12 = vsel %vm654_vm5, 0.0, %v955_v11  ;;  %v959_v13 = vrot.slane %v952_v9, 4  ;;  %v957_v14 = vrot.slane %v948_v7, 4  ;;  %v961_v16 = vsel %vm654_vm5, %v955_v11, %v936_v3 }
 0x418   : > { %v966_v15 = vrot.slane %v956_v12, 4  ;;  %v954_v17 = vsel %vm654_vm5, 0.0, %v953_v10  ;;  %v965_v19 = vperm.slane %v961_v16, %v3479_v50 }
 0x419   : > { %v960_v18 = vsel %vm654_vm5, 0.0, %v959_v13  ;;  %v972_v20 = vsel %vm654_vm5, %v959_v13, %v948_v7  ;;  %v958_v24 = vsel %vm654_vm5, 0.0, %v957_v14 }
 0x41a   : > { %v967_v21 = vsel %vm654_vm5, %v966_v15, %v954_v17  ;;  %v976_v22 = vperm.slane %v972_v20, %v3479_v50  ;;  %v977_v23 = vrot.slane %v960_v18, 4  ;;  %v985_v26 = vrot.slane %v965_v19, 4 }
 0x41b   : > { %v971_v25 = vperm.slane %v967_v21, %v3479_v50 }
 0x41c   : > { %v978_v27 = vsel %vm654_vm5, %v977_v23, %v958_v24  ;;  %v997_v29 = vrot.slane %v976_v22, 4 }
 0x41d   : > { %v982_v37 = vperm.slane %v978_v27, %v3479_v50  ;;  %v986_v39 = vsel %vm654_vm5, %v971_v25, %v985_v26  ;;  %v983_v38 = vrot.slane %v971_v25, 4 }
 0x41e   : > { %v994_v40 = vperm.slane %v986_v39, %v3484_v61 }
 0x41f   : > { %v998_v30 = vsel %vm654_vm5, %v982_v37, %v997_v29  ;;  %v984_v32 = vsel %vm654_vm5, %v983_v38, %v965_v19  ;;  %v995_v33 = vrot.slane %v982_v37, 4 }
 0x420   : > { %v1006_v41 = vperm.slane %v998_v30, %v3484_v61  ;;  %v1013_v42 = vrot.slane %v994_v40, 4  ;;  %v990_v44 = vperm.slane %v984_v32, %v3484_v61 }
 0x421   : > { %v996_v45 = vsel %vm654_vm5, %v995_v33, %v976_v22 }
 0x422   : > { %v1014_v46 = vsel %vm654_vm5, %v1006_v41, %v1013_v42  ;;  %v1002_v36 = vperm.slane %v996_v45, %v3484_v61  ;;  %v1009_v47 = vrot.slane %v990_v44, 4  ;;  %v1011_v48 = vrot.slane %v1006_v41, 4 }
 0x423   : > { %1254 = vmatpush.msrb.mxu1 %v1014_v46 }
 0x424   : > { %v1007_v49 = vrot.slane %v1002_v36, 4  ;;  %v1010_v51 = vsel %vm654_vm5, %v1002_v36, %v1009_v47  ;;  %v1012_v52 = vsel %vm654_vm5, %v1011_v48, %v994_v40 }
 0x425   : > { %1208 = vmatpush.msrb.mxu3 %v1010_v51  ;;  %1231 = vmatpush.msrb.mxu0 %v1012_v52 }
 0x426   : > { %v1008_v53 = vsel %vm654_vm5, %v1007_v49, %v990_v44 }
 0x427   : > { %1185 = vmatpush.msra.mxu2 %v1008_v53 }
 0x46d   : > { %v1155_v54 = vpop.xlane.xlu0 %1154 }
 0x46e   : > { %2904 = vrcp.f32 %v1155_v54 }
 0x46f   : > { %v1149_v55 = vpop.xlane.xlu1 %1148 }
 0x470   : > { %2906 = vrcp.f32 %v1149_v55 }
 0x474   : > { %v2905_v43 = vpop.eup %2904 }
 0x475   : > { %v1165_v56 = vmul.f32 %v2905_v43, %v3583_v28 }
 0x476   : > { %v2907_v57 = vpop.eup %2906 }
 0x477   : > { %v1163_v58 = vmul.f32 %v2907_v57, %v3587_v35  ;;  %2708 = vmatmul.msk.f32.vlgmr.msrb.gmra.mxu0 %vm1018_vm6, %v1165_v56  ;;  %v1152_v59 = vpop.xlane.xlu1 %1151 }
 0x478   : > { %2908 = vrcp.f32 %v1152_v59 }
 0x479   : > { %2706 = vmatmul.msk.f32.vlgmr.msra.gmra.mxu2 %vm1018_vm6, %v1163_v58 }
 0x47e   : > { %v2909_v60 = vpop.eup %2908 }
 0x47f   : > { %v1158_v62 = vpop.xlane.xlu1 %1157  ;;  %v1164_v63 = vmul.f32 %v2909_v60, %v3591_v31 }
 0x480   : > { %2910 = vrcp.f32 %v1158_v62 }
 0x481   : > { %2707 = vmatmul.msk.f32.vlgmr.msrb.gmra.mxu3 %vm1018_vm6, %v1164_v63 }
 0x486   : > { %v2911_v1 = vpop.eup %2910 }
 0x487   : > { %v1166_v2 = vmul.f32 %v2911_v1, %v3595_v34 }
 0x489   : > { %2709 = vmatmul.msk.f32.vlgmr.msrb.gmra.mxu1 %vm1018_vm6, %v1166_v2 }
 0x4f4   : > { %v1233_v3 = vpop.f32.mrf.mxu0 }
 0x4f5   : > { %v1259_v4 = vrot.slane %v1233_v3, 4 }
 0x4fc   : > { %v1187_v28 = vpop.f32.mrf.mxu2 }
 0x4fd   : > { %v1261_v35 = vrot.slane %v1187_v28, 4  ;;  %v1260_v6 = vsel %vm654_vm5, %v1259_v4, %v1187_v28 }
 0x4fe   : > { %v1266_v10 = vperm.slane %v1260_v6, %v3479_v50 }
 0x4ff   : > { %v1262_v5 = vsel %vm654_vm5, %v1233_v3, %v1261_v35 }
 0x500   : > { %v1270_v7 = vperm.slane %v1262_v5, %v3479_v50  ;;  %v1285_v16 = vrot.slane %v1266_v10, 4 }
 0x502   : > { %v1297_v13 = vrot.slane %v1270_v7, 4 }
 0x504   : > { %v1210_v9 = vpop.f32.mrf.mxu3 }
 0x505   : > { %v1273_v31 = vrot.slane %v1210_v9, 4 }
 0x506   : > { %v1256_v11 = vpop.f32.mrf.mxu1 }
 0x507   : > { %v1271_v12 = vrot.slane %v1256_v11, 4  ;;  %v1274_v34 = vsel %vm654_vm5, %v1256_v11, %v1273_v31  ;;  %v1387_v31 = vld [vmem:[%s4136_s4 + $0x8] sm:$0xff] }
 0x508   : > { %v1282_v14 = vperm.slane %v1274_v34, %v3479_v50 }
 0x509   : > { %v1272_v15 = vsel %vm654_vm5, %v1271_v12, %v1210_v9  ;;  %v1388_v9 = vld [vmem:[%s4136_s4 + $0x10] sm:$0xff] }
 0x50a   : > { %v1278_v17 = vperm.slane %v1272_v15, %v3479_v50  ;;  %v1295_v18 = vrot.slane %v1282_v14, 4  ;;  %v1298_v19 = vsel %vm654_vm5, %v1282_v14, %v1297_v13 }
 0x50b   : > { %v1306_v20 = vperm.slane %v1298_v19, %v3484_v61 }
 0x50c   : > { %v1283_v21 = vrot.slane %v1278_v17, 4  ;;  %v1286_v22 = vsel %vm654_vm5, %v1278_v17, %v1285_v16  ;;  %v1296_v23 = vsel %vm654_vm5, %v1295_v18, %v1270_v7  ;;  %v1389_v7 = vld [vmem:[%s4136_s4 + $0x18] sm:$0xff]  ;;  %v2879_v16 = vld [vmem:[#allocation7] ss:$0 sm:$0xff] }
 0x50d   : > { %v1294_v24 = vperm.slane %v1286_v22, %v3484_v61  ;;  %v1302_v25 = vperm.slane %v1296_v23, %v3484_v61  ;;  %v1313_v26 = vrot.slane %v1306_v20, 4  ;;  %1409 = vmatpush.msrb.mxu2 %v1389_v7 }
 0x50e   : > { %v1284_v27 = vsel %vm654_vm5, %v1283_v21, %v1266_v10  ;;  %v1386_v10 = vld [vmem:[%s4136_s4] sm:$0xff] }
 0x50f   : > { %v1290_v29 = vperm.slane %v1284_v27, %v3484_v61  ;;  %v1309_v37 = vrot.slane %v1294_v24, 4  ;;  %v1311_v39 = vrot.slane %v1302_v25, 4  ;;  %v1314_v38 = vsel %vm654_vm5, 0.0, %v1313_v26  ;;  %1410 = vmatpush.msrb.mxu2 %v1388_v9  ;;  %v1451_v27 = vld [vmem:[%s4140_s8 + $0x8] sm:$0xff] }
 0x510   : > { %v1326_v40 = vsel %vm654_vm5, %v1313_v26, %v1302_v25  ;;  %v1331_v30 = vrot.slane %v1314_v38, 4  ;;  %v1453_v26 = vld [vmem:[%s4140_s8 + $0x18] sm:$0xff]  ;;  %v1526_v9 = vld [vmem:[%s4182_s26 + $0x8] sm:$0xff] }
 0x511   : > { %v1307_v32 = vrot.slane %v1290_v29, 4  ;;  %v1310_v33 = vsel %vm654_vm5, 0.0, %v1309_v37  ;;  %v1312_v41 = vsel %vm654_vm5, 0.0, %v1311_v39  ;;  %v1330_v42 = vperm.slane %v1326_v40, %v3479_v50  ;;  %1411 = vmatpush.msrb.mxu2 %v1387_v31  ;;  %1473 = vmatpush.msra.mxu3 %v1453_v26 }
 0x512   : > { %v1320_v44 = vrot.slane %v1310_v33, 4  ;;  %v1315_v45 = vsel %vm654_vm5, %v1309_v37, %v1290_v29  ;;  %v1332_v46 = vsel %vm654_vm5, %v1331_v30, %v1312_v41  ;;  %v1450_v29 = vld [vmem:[%s4140_s8] sm:$0xff] }
 0x513   : > { %v1308_v36 = vsel %vm654_vm5, 0.0, %v1307_v32  ;;  %v1319_v47 = vperm.slane %v1315_v45, %v3479_v50  ;;  %v1336_v48 = vperm.slane %v1332_v46, %v3479_v50  ;;  %v1351_v49 = vrot.slane %v1330_v42, 4  ;;  %1412 = vmatpush.msrb.mxu2 %v1386_v10  ;;  %v1525_v10 = vld [vmem:[%s4182_s26] sm:$0xff] }
 0x514   : > { %v1321_v51 = vsel %vm654_vm5, %v1320_v44, %v1308_v36  ;;  %v2880_v44 = vld [vmem:[%s4144_s12] ss:$0 sm:$0xff]  ;;  %v2881_v36 = vld [vmem:[#allocation10] ss:$0 sm:$0xff] }
 0x515   : > { %v1325_v52 = vperm.slane %v1321_v51, %v3479_v50  ;;  %v1339_v53 = vrot.slane %v1319_v47, 4  ;;  %v1352_v54 = vsel %vm654_vm5, %v1336_v48, %v1351_v49  ;;  %v1349_v55 = vrot.slane %v1336_v48, 4  ;;  %v2882_v49 = vld [vmem:[%s4141_s9] ss:$0 sm:$0xff] }
 0x516   : > { %v1360_v43 = vperm.slane %v1352_v54, %v3484_v61 }
 0x517   : > { %v1340_v56 = vsel %vm654_vm5, %v1325_v52, %v1339_v53  ;;  %v1337_v57 = vrot.slane %v1325_v52, 4  ;;  %v1350_v58 = vsel %vm654_vm5, %v1349_v55, %v1330_v42 }
 0x518   : > { %v1348_v59 = vperm.slane %v1340_v56, %v3484_v61  ;;  %v1365_v60 = vrot.slane %v1360_v43, 4  ;;  %v1356_v62 = vperm.slane %v1350_v58, %v3484_v61 }
 0x519   : > { %v1338_v63 = vsel %vm654_vm5, %v1337_v57, %v1319_v47  ;;  %v1532_v57 = vld [vmem:[%s4182_s26 + $0x38] sm:$0xff] }
 0x51a   : > { %v1366_v1 = vsel %vm654_vm5, %v1365_v60, %v1348_v59  ;;  %v1344_v2 = vperm.slane %v1338_v63, %v3484_v61  ;;  %v1361_v28 = vrot.slane %v1356_v62, 4  ;;  %v1367_v5 = vrot.slane %v1348_v59, 4  ;;  %1549 = vmatpush.msra.mxu0 %v1532_v57  ;;  %v1531_v60 = vld [vmem:[%s4182_s26 + $0x30] sm:$0xff] }
 0x51b   : > { %1374 = vrot.lane.b32.xlu1 %v1366_v1, %s3182_s5  ;;  %v1530_v1 = vld [vmem:[%s4182_s26 + $0x28] sm:$0xff] }
 0x51c   : > { %v1363_v35 = vrot.slane %v1344_v2, 4  ;;  %v1362_v3 = vsel %vm654_vm5, %v1361_v28, %v1344_v2  ;;  %v1368_v6 = vsel %vm654_vm5, %v1360_v43, %v1367_v5  ;;  %1550 = vmatpush.msra.mxu0 %v1531_v60  ;;  %v1529_v28 = vld [vmem:[%s4182_s26 + $0x20] sm:$0xff] }
 0x51e   : > { %v1364_v4 = vsel %vm654_vm5, %v1356_v62, %v1363_v35  ;;  %1551 = vmatpush.msra.mxu0 %v1530_v1 }
 0x51f   : > { %1370 = vrot.lane.b32.xlu2 %v1364_v4, %s3183_s13  ;;  %v1528_v4 = vld [vmem:[%s4182_s26 + $0x18] sm:$0xff] }
 0x520   : > { %1552 = vmatpush.msra.mxu0 %v1529_v28 }
 0x522   : > { %1553 = vmatpush.msra.mxu0 %v1528_v4 }
 0x527   : > { %1378 = vrot.lane.b32.xlu2 %v1368_v6, %s3184_s22  ;;  %v1527_v6 = vld [vmem:[%s4182_s26 + $0x10] sm:$0xff] }
 0x528   : > { %1554 = vmatpush.msra.mxu0 %v1527_v6 }
 0x52a   : > { %1555 = vmatpush.msra.mxu0 %v1526_v9 }
 0x52c   : > { %1556 = vmatpush.msra.mxu0 %v1525_v10 }
 0x579   : > { %v1371_v11 = vpop.permute.xlu2 %1370 }
 0x57a   : > { %v1381_v12 = vsel %vm1018_vm6, %v1362_v3, %v1371_v11 }
 0x581   : > { %v1379_v13 = vpop.permute.xlu2 %1378 }
 0x58d   : > { %v1375_v34 = vpop.permute.xlu1 %1374 }
 0x58e   : > { %v1383_v14 = vsel %vm1382_vm7, %v1381_v12, %v1375_v34 }
 0x58f   : > { %v1385_v15 = vsel %vm1384_vm8, %v1383_v14, %v1379_v13 }
 0x590   : > { %2710 = vmatmul.msk.f32.vlgmr.msrb.gmra.mxu2 %vm573_vm0, %v1385_v15 }
 0x613   : > { %v1414_v17 = vpop.f32.mrf.mxu2 }
 0x614   : > { %v1415_v18 = vadd.f32 %v2879_v16, %v1414_v17 }
 0x616   : > { %v3707_v19 = vadd.f32 %v1415_v18, %v3421_v0  ;;  %v1452_v0 = vld [vmem:[%s4140_s8 + $0x10] sm:$0xff] }
 0x617   : > { %1474 = vmatpush.msra.mxu3 %v1452_v0 }
 0x618   : > { %v1420_v20 = vsel %vm573_vm0, %v3707_v19, 0.0 }
 0x619   : > { %1421 = vadd.xlane.f32.xlu2 %v1420_v20  ;;  %1475 = vmatpush.msra.mxu3 %v1451_v27 }
 0x61b   : > { %1476 = vmatpush.msra.mxu3 %v1450_v29 }
 0x68c   : > { %v1422_v21 = vpop.xlane.xlu2 %1421 }
 0x68d   : > { %v1423_v22 = vmul.f32 %v1422_v21, %v3425_v8 }
 0x68f   : > { %v1424_v23 = vsub.f32 %v3707_v19, %v1423_v22 }
 0x691   : > { %v1425_v24 = vmul.f32 %v1424_v23, %v1424_v23 }
 0x693   : > { %v1426_v25 = vsel %vm573_vm0, %v1425_v24, 0.0 }
 0x694   : > { %1427 = vadd.xlane.f32.xlu1 %v1426_v25 }
 0x707   : > { %v1428_v37 = vpop.xlane.xlu1 %1427 }
 0x708   : > { %v1429_v39 = vmul.f32 %v1428_v37, %v3425_v8 }
 0x70a   : > { %v1430_v38 = vadd.f32 1e-06, %v1429_v39 }
 0x70c   : > { %2912 = vrsqrt.f32 %v1430_v38  ;;  %vm1437_vm10 = vweird.f32 %v1430_v38 }
 0x712   : > { %v2913_v40 = vpop.eup %2912 }
 0x713   : > { %v1432_v30 = vmul.f32 %v2913_v40, %v1430_v38  ;;  %vm1438_vm9 = vweird.f32 %v2913_v40 }
 0x714   : > { %vm1439_vm11 = vmor %vm1437_vm10, %vm1438_vm9 }
 0x715   : > { %v1433_v32 = vmul.f32 %v2913_v40, %v1432_v30 }
 0x717   : > { %v1434_v33 = vmul.f32 0.5, %v1433_v32  ;;  %v2883_v32 = vld [vmem:[%s4183_s28] ss:$0 sm:$0xff] }
 0x719   : > { %v1435_v41 = vsub.f32 1.5, %v1434_v33 }
 0x71b   : > { %v1436_v42 = vmul.f32 %v2913_v40, %v1435_v41 }
 0x71d   : > { %v1440_v45 = vsel %vm1439_vm11, %v2913_v40, %v1436_v42 }
 0x71e   : > { %v1441_v46 = vmul.f32 %v1440_v45, %v1424_v23 }
 0x720   : > { %v1445_v47 = vmul.f32 %v2880_v44, %v1441_v46 }
 0x722   : > { %v1449_v48 = vadd.f32 %v2881_v36, %v1445_v47 }
 0x724   : > { %2711 = vmatmul.msk.f32.vlgmr.msra.gmra.mxu3 %vm573_vm0, %v1449_v48 }
 0x7a7   : > { %v1478_v51 = vpop.f32.mrf.mxu3 }
 0x7a8   : > { %v1479_v52 = vadd.f32 %v2882_v49, %v1478_v51  ;;  %v2718_v49 = vld [vmem:[%s4134_s2 + $0x38] sm:$0xff]  ;;  %v2716_v51 = vld [vmem:[%s4134_s2 + $0x28] sm:$0xff] }
 0x7a9   : > { %1621 = vmatpush.msra.mxu1 %v2718_v49 }
 0x7aa   : > { %v1482_v53 = vmul.f32 0.70710677, %v1479_v52  ;;  %v1481_v38 = vmul.f32 0.5, %v1479_v52  ;;  %v2715_v52 = vld [vmem:[%s4134_s2 + $0x20] sm:$0xff] }
 0x7ac   : > { %v1483_v54 = vmul.f32 %v1482_v53, %v1482_v53 }
 0x7ae   : > { %v1484_v55 = vmin.f32 %v1483_v54, 16.0 }
 0x7b0   : > { %v1485_v43 = vmul.f32 2.1237322e-06, %v1484_v55  ;;  %v1496_v56 = vmul.f32 3.8918573e-05, %v1484_v55 }
 0x7b2   : > { %v1486_v58 = vadd.f32 0.00028619796, %v1485_v43  ;;  %v1497_v59 = vadd.f32 0.001143296, %v1496_v56 }
 0x7b4   : > { %v1487_v62 = vmul.f32 %v1486_v58, %v1484_v55  ;;  %v1498_v63 = vmul.f32 %v1497_v59, %v1484_v55 }
 0x7b6   : > { %v1499_v2 = vadd.f32 0.014752088, %v1498_v63  ;;  %v1488_v35 = vadd.f32 0.0036580483, %v1487_v62  ;;  %v2884_v62 = vld [vmem:[%s4138_s6 + $0x1] ss:$0 sm:$0xff] }
 0x7b8   : > { %v1500_v3 = vmul.f32 %v1499_v2, %v1484_v55  ;;  %v1489_v7 = vmul.f32 %v1488_v35, %v1484_v55  ;;  %v2885_v2 = vld [vmem:[#allocation8 + $0x1] ss:$0 sm:$0xff] }
 0x7ba   : > { %v1501_v5 = vadd.f32 0.112945676, %v1500_v3  ;;  %v1490_v12 = vadd.f32 0.05243302, %v1489_v7  ;;  %v2886_v3 = vld [vmem:[%s4135_s3 + $0x1] ss:$0 sm:$0xff] }
 0x7bc   : > { %v1502_v31 = vmul.f32 %v1501_v5, %v1484_v55  ;;  %v1491_v14 = vmul.f32 %v1490_v12, %v1484_v55 }
 0x7be   : > { %v1503_v11 = vadd.f32 0.4994258, %v1502_v31  ;;  %v1492_v15 = vadd.f32 0.18741608, %v1491_v14 }
 0x7c0   : > { %v1504_v34 = vmul.f32 %v1503_v11, %v1484_v55  ;;  %v1493_v17 = vmul.f32 %v1492_v15, %v1484_v55 }
 0x7c2   : > { %v1505_v13 = vadd.f32 1.0, %v1504_v34  ;;  %v1494_v22 = vadd.f32 1.1283791, %v1493_v17 }
 0x7c4   : > { %2914 = vrcp.f32 %v1505_v13  ;;  %v1517_v21 = vand.u32 2147483648, %v1505_v13  ;;  %v1515_v24 = vand.u32 2147483647, %v1505_v13  ;;  %vm1511_vm13 = vweird.f32 %v1505_v13 }
 0x7c5   : > { %v1495_v0 = vmul.f32 %v1494_v22, %v1482_v53 }
 0x7c6   : > { %v1518_v26 = vor.u32 1.1754944e-38, %v1517_v21  ;;  %vm1516_vm15 = vcmp.eq.f32.partialorder %v1515_v24, 8.507059e+37 }
 0x7ca   : > { %v2915_v16 = vpop.eup %2914 }
 0x7cb   : > { %v1507_v18 = vmul.f32 %v2915_v16, %v1505_v13  ;;  %vm1512_vm12 = vweird.f32 %v2915_v16 }
 0x7cc   : > { %vm1513_vm14 = vmor %vm1511_vm13, %vm1512_vm12 }
 0x7cd   : > { %v1508_v20 = vsub.f32 1.0, %v1507_v18 }
 0x7cf   : > { %v1509_v23 = vmul.f32 %v2915_v16, %v1508_v20 }
 0x7d1   : > { %v1510_v25 = vadd.f32 %v2915_v16, %v1509_v23 }
 0x7d3   : > { %v1514_v27 = vsel %vm1513_vm14, %v2915_v16, %v1510_v25 }
 0x7d4   : > { %v1519_v29 = vsel %vm1516_vm15, %v1518_v26, %v1514_v27 }
 0x7d5   : > { %v1520_v37 = vmul.f32 %v1519_v29, %v1495_v0 }
 0x7d7   : > { %v2712_v39 = vclamps-f32 %v1520_v37, 1.0 }
 0x7d9   : > { %v1523_v40 = vadd.f32 1.0, %v2712_v39 }
 0x7db   : > { %v1524_v30 = vmul.f32 %v1523_v40, %v1481_v38 }
 0x7dd   : > { %2713 = vmatmul.msk.f32.vlgmr.msra.gmra.mxu0 %vm1537_vm1, %v1524_v30 }
 0x85a   : > { %v1558_v33 = vpop.f32.mrf.mxu0 }
 0x85b   : > { %v1559_v41 = vadd.f32 %v2883_v32, %v1558_v33 }
 0x85d   : > { %v3763_v42 = vadd.f32 %v1559_v41, %v3707_v19  ;;  %v2717_v19 = vld [vmem:[%s4134_s2 + $0x30] sm:$0xff] }
 0x85e   : > { %1622 = vmatpush.msra.mxu1 %v2717_v19 }
 0x85f   : > { %v1566_v44 = vsel %vm573_vm0, %v3763_v42, 0.0 }
 0x860   : > { %1567 = vadd.xlane.f32.xlu0 %v1566_v44  ;;  %1623 = vmatpush.msra.mxu1 %v2716_v51 }
 0x862   : > { %1624 = vmatpush.msra.mxu1 %v2715_v52 }
 0x8d3   : > { %v1568_v45 = vpop.xlane.xlu0 %1567 }
 0x8d4   : > { %v1569_v46 = vmul.f32 %v1568_v45, %v3425_v8 }
 0x8d6   : > { %v1570_v36 = vsub.f32 %v3763_v42, %v1569_v46 }
 0x8d8   : > { %v1571_v47 = vmul.f32 %v1570_v36, %v1570_v36 }
 0x8da   : > { %v1572_v48 = vsel %vm573_vm0, %v1571_v47, 0.0 }
 0x8db   : > { %1573 = vadd.xlane.f32.xlu0 %v1572_v48 }
 0x94e   : > { %v1574_v53 = vpop.xlane.xlu0 %1573 }
 0x94f   : > { %v1575_v54 = vmul.f32 %v1574_v53, %v3425_v8 }
 0x951   : > { %v1576_v55 = vadd.f32 1e-06, %v1575_v54 }
 0x953   : > { %2916 = vrsqrt.f32 %v1576_v55  ;;  %vm1583_vm3 = vweird.f32 %v1576_v55 }
 0x959   : > { %v2917_v43 = vpop.eup %2916 }
 0x95a   : > { %v1578_v56 = vmul.f32 %v2917_v43, %v1576_v55  ;;  %vm1584_vm2 = vweird.f32 %v2917_v43 }
 0x95b   : > { %vm1585_vm4 = vmor %vm1583_vm3, %vm1584_vm2 }
 0x95c   : > { %v1579_v57 = vmul.f32 %v2917_v43, %v1578_v56 }
 0x95e   : > { %v1580_v58 = vmul.f32 0.5, %v1579_v57 }
 0x960   : > { %v1581_v59 = vsub.f32 1.5, %v1580_v58 }
 0x962   : > { %v1582_v60 = vmul.f32 %v2917_v43, %v1581_v59 }
 0x964   : > { %v1586_v63 = vsel %vm1585_vm4, %v2917_v43, %v1582_v60 }
 0x965   : > { %v1587_v1 = vmul.f32 %v1586_v63, %v1570_v36 }
 0x967   : > { %v1591_v28 = vmul.f32 %v2884_v62, %v1587_v1 }
 0x969   : > { %v1595_v35 = vadd.f32 %v2885_v2, %v1591_v28 }
 0x96b   : > { %2720 = vmatmul.msk.f32.vlgmr.msra.gmra.mxu1 %vm573_vm0, %v1595_v35 }
 0x9e8   : > { %v1626_v4 = vpop.f32.mrf.mxu1 }
 0x9e9   : > { %v3790_v5 = vadd.f32 %v2886_v3, %v1626_v4 }
 0x9eb   : > { %1755 = vrot.lane.b32.xlu1 %v3790_v5, %s3175_s11  ;;  %1753 = vrot.lane.b32.xlu2 %v3790_v5, %s3178_s16  ;;  %v1629_v6 = vmul.f32 0.35355338, %v3790_v5 }
 0x9ec   : > { %1751 = vrot.lane.b32.xlu0 %v3790_v5, %s3176_s15 }
 0x9ed   : > { %v1642_v18 = vrot.slane %v1629_v6, 4 }
 0x9f3   : > { %1634 = vrot.lane.b32.xlu1 %v1629_v6, %s3178_s16 }
 0x9f4   : > { %1757 = vrot.lane.b32.xlu0 %v3790_v5, %s3177_s10 }
 0xa45   : > { %v3802_v7 = vpop.permute.xlu2 %1753 }
 0xa46   : > { %1761 = vrot.lane.b32.xlu2 %v3802_v7, %s3177_s10 }
 0xa4e   : > { %1631 = vrot.lane.b32.xlu2 %v1629_v6, %s3176_s15  ;;  %s2757_s15 = sshll.u32 %s3284_s20, 3  ;;  %s2551_s20 = scalar_lea.sflag [#allocation4], %s3397_s14 }
 0xa5d   : > { %v3811_v31 = vpop.permute.xlu1 %1755 }
 0xa5e   : > { %v3807_v9 = vpop.permute.xlu0 %1751 }
 0xa5f   : > { %1759 = vrot.lane.b32.xlu0 %v3807_v9, %s3177_s10 }
 0xa65   : > { %v1635_v13 = vpop.permute.xlu1 %1634 }
 0xa66   : > { %v1758_v10 = vpop.permute.xlu0 %1757  ;;  %v1640_v16 = vrot.slane %v1635_v13, 4  ;;  %v1643_v23 = vsel %vm654_vm5, %v1635_v13, %v1642_v18 }
 0xa67   : > { %1763 = vrot.lane.b32.xlu0 %v3811_v31, %s3177_s10  ;;  %v1771_v34 = vrot.slane %v1758_v10, 4  ;;  %v1651_v39 = vperm.slane %v1643_v23, %v3479_v50 }
 0xa68   : > { %v1641_v22 = vsel %vm654_vm5, %v1640_v16, %v1629_v6 }
 0xa69   : > { %v1647_v37 = vperm.slane %v1641_v22, %v3479_v50  ;;  %v1678_v51 = vrot.slane %v1651_v39, 4 }
 0xa6b   : > { %v1666_v19 = vrot.slane %v1647_v37, 4 }
 0xa6f   : > { %1637 = vrot.lane.b32.xlu0 %v1629_v6, %s3175_s11 }
 0xaa0   : > { %v1762_v11 = vpop.permute.xlu2 %1761 }
 0xaa1   : > { %v1769_v14 = vrot.slane %v1762_v11, 4  ;;  %v1772_v15 = vsel %vm654_vm5, %v1762_v11, %v1771_v34 }
 0xaa2   : > { %v1780_v20 = vperm.slane %v1772_v15, %v3479_v50 }
 0xaa3   : > { %v1770_v17 = vsel %vm654_vm5, %v1769_v14, %v1758_v10 }
 0xaa4   : > { %v1776_v24 = vperm.slane %v1770_v17, %v3479_v50  ;;  %v1807_v27 = vrot.slane %v1780_v20, 4 }
 0xaa6   : > { %v1795_v40 = vrot.slane %v1776_v24, 4 }
 0xaa8   : > { %v1632_v41 = vpop.permute.xlu2 %1631 }
 0xaa9   : > { %v1654_v52 = vrot.slane %v1632_v41, 4 }
 0xad1   : > { %v1760_v12 = vpop.permute.xlu0 %1759 }
 0xad2   : > { %v1783_v21 = vrot.slane %v1760_v12, 4 }
 0xad9   : > { %v1764_v25 = vpop.permute.xlu0 %1763 }
 0xada   : > { %v1781_v26 = vrot.slane %v1764_v25, 4  ;;  %v1784_v0 = vsel %vm654_vm5, %v1764_v25, %v1783_v21 }
 0xadb   : > { %v1792_v29 = vperm.slane %v1784_v0, %v3479_v50 }
 0xadc   : > { %v1782_v38 = vsel %vm654_vm5, %v1781_v26, %v1760_v12 }
 0xadd   : > { %v1788_v30 = vperm.slane %v1782_v38, %v3479_v50  ;;  %v1805_v32 = vrot.slane %v1792_v29, 4  ;;  %v1808_v33 = vsel %vm654_vm5, %v1792_v29, %v1807_v27 }
 0xade   : > { %v1816_v44 = vperm.slane %v1808_v33, %v3484_v61 }
 0xadf   : > { %v1793_v45 = vrot.slane %v1788_v30, 4  ;;  %v1796_v46 = vsel %vm654_vm5, %v1788_v30, %v1795_v40  ;;  %v1806_v36 = vsel %vm654_vm5, %v1805_v32, %v1780_v20 }
 0xae0   : > { %v1804_v47 = vperm.slane %v1796_v46, %v3484_v61  ;;  %v1812_v48 = vperm.slane %v1806_v36, %v3484_v61  ;;  %v1823_v49 = vrot.slane %v1816_v44, 4 }
 0xae1   : > { %v1794_v53 = vsel %vm654_vm5, %v1793_v45, %v1776_v24  ;;  %v1638_v54 = vpop.permute.xlu0 %1637 }
 0xae2   : > { %v1800_v55 = vperm.slane %v1794_v53, %v3484_v61  ;;  %v1819_v43 = vrot.slane %v1804_v47, 4  ;;  %v1821_v56 = vrot.slane %v1812_v48, 4  ;;  %v1824_v57 = vsel %vm654_vm5, 0.0, %v1823_v49 }
 0xae3   : > { %v1836_v58 = vsel %vm654_vm5, %v1823_v49, %v1812_v48  ;;  %v1841_v59 = vrot.slane %v1824_v57, 4  ;;  %v1652_v60 = vrot.slane %v1638_v54, 4  ;;  %v1655_v62 = vsel %vm654_vm5, %v1638_v54, %v1654_v52 }
 0xae4   : > { %v1817_v63 = vrot.slane %v1800_v55, 4  ;;  %v1820_v1 = vsel %vm654_vm5, 0.0, %v1819_v43  ;;  %v1822_v2 = vsel %vm654_vm5, 0.0, %v1821_v56  ;;  %v1825_v28 = vsel %vm654_vm5, %v1819_v43, %v1800_v55 }
 0xae5   : > { %v1830_v35 = vrot.slane %v1820_v1, 4  ;;  %v1840_v3 = vperm.slane %v1836_v58, %v3479_v50  ;;  %v1842_v4 = vsel %vm654_vm5, %v1841_v59, %v1822_v2  ;;  %v1653_v6 = vsel %vm654_vm5, %v1652_v60, %v1632_v41 }
 0xae6   : > { %v1818_v10 = vsel %vm654_vm5, 0.0, %v1817_v63  ;;  %v1846_v11 = vperm.slane %v1842_v4, %v3479_v50  ;;  %v1659_v12 = vperm.slane %v1653_v6, %v3479_v50  ;;  %v1663_v34 = vperm.slane %v1655_v62, %v3479_v50 }
 0xae7   : > { %v1861_v13 = vrot.slane %v1840_v3, 4  ;;  %v1829_v14 = vperm.slane %v1825_v28, %v3479_v50  ;;  %v1831_v15 = vsel %vm654_vm5, %v1830_v35, %v1818_v10 }
 0xae8   : > { %v1664_v16 = vrot.slane %v1659_v12, 4  ;;  %v1667_v17 = vsel %vm654_vm5, %v1659_v12, %v1666_v19  ;;  %v1676_v18 = vrot.slane %v1663_v34, 4  ;;  %v1679_v20 = vsel %vm654_vm5, %v1663_v34, %v1678_v51 }
 0xae9   : > { %v1675_v21 = vperm.slane %v1667_v17, %v3484_v61  ;;  %v1687_v22 = vperm.slane %v1679_v20, %v3484_v61  ;;  %v1835_v23 = vperm.slane %v1831_v15, %v3479_v50  ;;  %v1849_v24 = vrot.slane %v1829_v14, 4 }
 0xaea   : > { %v1665_v25 = vsel %vm654_vm5, %v1664_v16, %v1647_v37  ;;  %v1677_v26 = vsel %vm654_vm5, %v1676_v18, %v1651_v39  ;;  %v1862_v0 = vsel %vm654_vm5, %v1846_v11, %v1861_v13  ;;  %v1859_v27 = vrot.slane %v1846_v11, 4 }
 0xaeb   : > { %v1671_v29 = vperm.slane %v1665_v25, %v3484_v61  ;;  %v1683_v38 = vperm.slane %v1677_v26, %v3484_v61  ;;  %v1690_v40 = vrot.slane %v1675_v21, 4  ;;  %v1694_v30 = vrot.slane %v1687_v22, 4 }
 0xaec   : > { %v1850_v32 = vsel %vm654_vm5, %v1835_v23, %v1849_v24  ;;  %v1870_v33 = vperm.slane %v1862_v0, %v3484_v61  ;;  %v1847_v41 = vrot.slane %v1835_v23, 4  ;;  %v1860_v44 = vsel %vm654_vm5, %v1859_v27, %v1840_v3 }
 0xaed   : > { %v1688_v45 = vrot.slane %v1671_v29, 4  ;;  %v1691_v37 = vsel %vm654_vm5, 0.0, %v1690_v40  ;;  %v1692_v39 = vrot.slane %v1683_v38, 4  ;;  %v1695_v46 = vsel %vm654_vm5, 0.0, %v1694_v30 }
 0xaee   : > { %v1696_v36 = vsel %vm654_vm5, %v1690_v40, %v1671_v29  ;;  %v1701_v47 = vrot.slane %v1691_v37, 4  ;;  %v1707_v48 = vsel %vm654_vm5, %v1694_v30, %v1683_v38  ;;  %v1712_v49 = vrot.slane %v1695_v46, 4  ;;  %v2938_v38 = vld [vmem:[%s504_s23] ss:$0 sm:$0xff] }
 0xaef   : > { %v1689_v19 = vsel %vm654_vm5, 0.0, %v1688_v45  ;;  %v1693_v51 = vsel %vm654_vm5, 0.0, %v1692_v39  ;;  %v1711_v52 = vperm.slane %v1707_v48, %v3479_v50  ;;  %v1858_v53 = vperm.slane %v1850_v32, %v3484_v61 }
 0xaf0   : > { %v1713_v54 = vsel %vm654_vm5, %v1712_v49, %v1693_v51  ;;  %v1875_v55 = vrot.slane %v1870_v33, 4  ;;  %v1848_v43 = vsel %vm654_vm5, %v1847_v41, %v1829_v14  ;;  %v1866_v56 = vperm.slane %v1860_v44, %v3484_v61 }
 0xaf1   : > { %v1717_v57 = vperm.slane %v1713_v54, %v3479_v50  ;;  %v1732_v58 = vrot.slane %v1711_v52, 4  ;;  %v1854_v59 = vperm.slane %v1848_v43, %v3484_v61  ;;  %v1877_v60 = vrot.slane %v1858_v53, 4 }
 0xaf2   : > { %v1876_v62 = vsel %vm654_vm5, %v1875_v55, %v1858_v53  ;;  %v1871_v63 = vrot.slane %v1866_v56, 4  ;;  %v1700_v1 = vperm.slane %v1696_v36, %v3479_v50  ;;  %v1702_v2 = vsel %vm654_vm5, %v1701_v47, %v1689_v19 }
 0xaf3   : > { %2725 = vmatpush.xpose.msk.msrb.mxu1 %vm1018_vm6, %v1876_v62  ;;  %v1878_v28 = vsel %vm654_vm5, %v1870_v33, %v1877_v60  ;;  %v1873_v35 = vrot.slane %v1854_v59, 4  ;;  %v1706_v3 = vperm.slane %v1702_v2, %v3479_v50  ;;  %v1733_v4 = vsel %vm654_vm5, %v1717_v57, %v1732_v58 }
 0xaf4   : > { %v1872_v6 = vsel %vm654_vm5, %v1871_v63, %v1854_v59  ;;  %v1720_v10 = vrot.slane %v1700_v1, 4  ;;  %v1741_v11 = vperm.slane %v1733_v4, %v3484_v61  ;;  %v1730_v12 = vrot.slane %v1717_v57, 4 }
 0xaf5   : > { %2721 = vmatpush.xpose.msk.msra.mxu2 %vm1018_vm6, %v1872_v6  ;;  %v1874_v34 = vsel %vm654_vm5, %v1866_v56, %v1873_v35  ;;  %v1718_v13 = vrot.slane %v1706_v3, 4  ;;  %v2870_v47 = vpack.i.bf16 %v3811_v31, %v3802_v7  ;;  %v2865_v48 = vpack.i.bf16 %v3807_v9, %v3790_v5 }
 0xaf6   : > { %2723 = vmatpush.xpose.msk.msrb.mxu3 %vm1018_vm6, %v1874_v34  ;;  %v1721_v14 = vsel %vm654_vm5, %v1706_v3, %v1720_v10  ;;  %v1746_v15 = vrot.slane %v1741_v11, 4  ;;  %v1731_v16 = vsel %vm654_vm5, %v1730_v12, %v1711_v52 }
 0xaf7   : > { %v1729_v17 = vperm.slane %v1721_v14, %v3484_v61  ;;  %v1719_v18 = vsel %vm654_vm5, %v1718_v13, %v1700_v1  ;;  %v1737_v20 = vperm.slane %v1731_v16, %v3484_v61 }
 0xaf8   : > { %v1725_v21 = vperm.slane %v1719_v18, %v3484_v61 }
 0xaf9   : > { %2727 = vmatpush.xpose.msk.msrb.mxu2 %vm1018_vm6, %v1878_v28  ;;  %v1747_v22 = vsel %vm654_vm5, %v1746_v15, %v1729_v17  ;;  %v1742_v23 = vrot.slane %v1737_v20, 4  ;;  %v1748_v0 = vrot.slane %v1729_v17, 4 }
 0xafa   : > { %2726 = vmatmul.msk.f32.vlgmr.msrb.gmra.mxu1 %vm1018_vm6, %v1747_v22  ;;  %v1744_v24 = vrot.slane %v1725_v21, 4 }
 0xafb   : > { %v1743_v25 = vsel %vm654_vm5, %v1742_v23, %v1725_v21  ;;  %v1749_v27 = vsel %vm654_vm5, %v1741_v11, %v1748_v0 }
 0xafc   : > { %2722 = vmatmul.msk.f32.vlgmr.msra.gmra.mxu2 %vm1018_vm6, %v1743_v25  ;;  %v1745_v26 = vsel %vm654_vm5, %v1737_v20, %v1744_v24 }
 0xafd   : > { %2724 = vmatmul.msk.f32.vlgmr.msrb.gmra.mxu3 %vm1018_vm6, %v1745_v26 }
 0xb04   : > { %2728 = vmatmul.msk.f32.vlgmr.msrb.gmra.mxu2 %vm1018_vm6, %v1749_v27 }
 0xb77   : > { %v2076_v29 = vpop.f32.mrf.mxu1 }
 0xb78   : > { %v2077_v40 = vadd.f32 %v2938_v38, %v2076_v29 }
 0xb7a   : > { %v2111_v30 = vsel %vm1018_vm6, %v2077_v40, -inf }
 0xb7b   : > { %2112 = vmax.xlane.f32.xlu0 %v2111_v30 }
 0xb7f   : > { %v2024_v32 = vpop.f32.mrf.mxu2 }
 0xb80   : > { %v2025_v33 = vadd.f32 %v2938_v38, %v2024_v32  ;;  %v2050_v44 = vpop.f32.mrf.mxu3 }
 0xb81   : > { %v2051_v45 = vadd.f32 %v2938_v38, %v2050_v44 }
 0xb82   : > { %v2105_v41 = vsel %vm1018_vm6, %v2025_v33, -inf }
 0xb83   : > { %2106 = vmax.xlane.f32.xlu2 %v2105_v41  ;;  %v2108_v36 = vsel %vm1018_vm6, %v2051_v45, -inf }
 0xb87   : > { %v2102_v37 = vpop.f32.mrf.mxu2 }
 0xb88   : > { %v2103_v39 = vadd.f32 %v2938_v38, %v2102_v37 }
 0xb8a   : > { %v2114_v46 = vsel %vm1018_vm6, %v2103_v39, -inf }
 0xb8b   : > { %2115 = vmax.xlane.f32.xlu1 %v2114_v46  ;;  %2109 = vmax.xlane.f32.xlu2 %v2108_v36 }
 0xb8f   : > { %2871 = vrot.lane.b32.xlu0 %v2870_v47, %s3181_s21 }
 0xba4   : > { %2866 = vrot.lane.b32.xlu1 %v2865_v48, %s3181_s21 }
 0xbee   : > { %v2113_v52 = vpop.xlane.xlu0 %2112 }
 0xbef   : > { %v2119_v57 = vsub.f32 %v2077_v40, %v2113_v52 }
 0xbf1   : > { %v2125_v5 = vmul.f32 1.442695, %v2119_v57 }
 0xbf6   : > { %v2107_v49 = vpop.xlane.xlu2 %2106 }
 0xbf7   : > { %v2117_v19 = vsub.f32 %v2025_v33, %v2107_v49 }
 0xbf9   : > { %v2121_v51 = vmul.f32 1.442695, %v2117_v19 }
 0xbfb   : > { %2918 = vpow2.f32 %v2121_v51 }
 0xbfe   : > { %v2116_v53 = vpop.xlane.xlu1 %2115  ;;  %v2110_v54 = vpop.xlane.xlu2 %2109 }
 0xbff   : > { %v2120_v55 = vsub.f32 %v2103_v39, %v2116_v53  ;;  %v2118_v43 = vsub.f32 %v2051_v45, %v2110_v54 }
 0xc01   : > { %v3916_v56 = vpop.eup %2918  ;;  %v2127_v7 = vmul.f32 1.442695, %v2120_v55  ;;  %v2123_v31 = vmul.f32 1.442695, %v2118_v43  ;;  %v2872_v1 = vpop.permute.xlu0 %2871 }
 0xc02   : > { %v2129_v58 = vsel %vm1018_vm6, %v3916_v56, 0.0  ;;  %v2874_v28 = vunpack.i.h.bf16 %v2872_v1  ;;  %v2873_v35 = vunpack.i.l.bf16 %v2872_v1 }
 0xc03   : > { %2920 = vpow2.f32 %v2127_v7  ;;  %2130 = vadd.xlane.f32.xlu2 %v2129_v58 }
 0xc04   : > { %2922 = vpow2.f32 %v2123_v31  ;;  %v1903_v4 = vrot.slane %v2874_v28, 4  ;;  %v1891_v6 = vrot.slane %v2873_v35, 4 }
 0xc05   : > { %2924 = vpow2.f32 %v2125_v5 }
 0xc09   : > { %v3920_v9 = vpop.eup %2920 }
 0xc0a   : > { %v3922_v59 = vpop.eup %2922  ;;  %v2138_v60 = vsel %vm1018_vm6, %v3920_v9, 0.0 }
 0xc0b   : > { %2139 = vadd.xlane.f32.xlu2 %v2138_v60  ;;  %v2132_v62 = vsel %vm1018_vm6, %v3922_v59, 0.0  ;;  %v3928_v63 = vpop.eup %2924 }
 0xc0c   : > { %2133 = vadd.xlane.f32.xlu0 %v2132_v62  ;;  %v2135_v2 = vsel %vm1018_vm6, %v3928_v63, 0.0 }
 0xc13   : > { %2136 = vadd.xlane.f32.xlu2 %v2135_v2 }
 0xc16   : > { %v2867_v3 = vpop.permute.xlu1 %2866 }
 0xc17   : > { %v2869_v10 = vunpack.i.h.bf16 %v2867_v3  ;;  %v2868_v11 = vunpack.i.l.bf16 %v2867_v3 }
 0xc19   : > { %v1904_v12 = vsel %vm654_vm5, %v1903_v4, %v2869_v10  ;;  %v1905_v34 = vrot.slane %v2869_v10, 4  ;;  %v1892_v13 = vsel %vm654_vm5, %v1891_v6, %v2868_v11  ;;  %v1893_v14 = vrot.slane %v2868_v11, 4 }
 0xc1a   : > { %v1910_v15 = vperm.slane %v1904_v12, %v3479_v50  ;;  %v1898_v16 = vperm.slane %v1892_v13, %v3479_v50 }
 0xc1b   : > { %v1906_v17 = vsel %vm654_vm5, %v2874_v28, %v1905_v34  ;;  %v1894_v18 = vsel %vm654_vm5, %v2873_v35, %v1893_v14 }
 0xc1c   : > { %v1914_v20 = vperm.slane %v1906_v17, %v3479_v50  ;;  %v1915_v21 = vrot.slane %v1910_v15, 4  ;;  %v1902_v22 = vperm.slane %v1894_v18, %v3479_v50  ;;  %v1917_v23 = vrot.slane %v1898_v16, 4 }
 0xc1e   : > { %v1927_v24 = vrot.slane %v1914_v20, 4  ;;  %v1916_v25 = vsel %vm654_vm5, %v1915_v21, %v1898_v16  ;;  %v1918_v26 = vsel %vm654_vm5, %v1910_v15, %v1917_v23  ;;  %v1929_v0 = vrot.slane %v1902_v22, 4 }
 0xc1f   : > { %v1922_v27 = vperm.slane %v1916_v25, %v3484_v61  ;;  %v1926_v29 = vperm.slane %v1918_v26, %v3484_v61 }
 0xc20   : > { %v1928_v38 = vsel %vm654_vm5, %v1927_v24, %v1902_v22  ;;  %v1930_v40 = vsel %vm654_vm5, %v1914_v20, %v1929_v0 }
 0xc21   : > { %v1934_v30 = vperm.slane %v1928_v38, %v3484_v61  ;;  %v1938_v32 = vperm.slane %v1930_v40, %v3484_v61  ;;  %v1939_v33 = vrot.slane %v1922_v27, 4  ;;  %v1941_v41 = vrot.slane %v1926_v29, 4 }
 0xc23   : > { %v1942_v44 = vsel %vm654_vm5, 0.0, %v1941_v41  ;;  %v1943_v45 = vrot.slane %v1934_v30, 4  ;;  %v1945_v37 = vrot.slane %v1938_v32, 4  ;;  %v1947_v39 = vsel %vm654_vm5, %v1941_v41, %v1922_v27 }
 0xc24   : > { %v1952_v46 = vrot.slane %v1942_v44, 4  ;;  %v1940_v36 = vsel %vm654_vm5, 0.0, %v1939_v33  ;;  %v1951_v48 = vperm.slane %v1947_v39, %v3479_v50 }
 0xc25   : > { %v1946_v47 = vsel %vm654_vm5, 0.0, %v1945_v37  ;;  %v1958_v49 = vsel %vm654_vm5, %v1945_v37, %v1934_v30  ;;  %v1944_v53 = vsel %vm654_vm5, 0.0, %v1943_v45 }
 0xc26   : > { %v1963_v19 = vrot.slane %v1946_v47, 4  ;;  %v1953_v51 = vsel %vm654_vm5, %v1952_v46, %v1940_v36  ;;  %v1962_v52 = vperm.slane %v1958_v49, %v3479_v50  ;;  %v1971_v55 = vrot.slane %v1951_v48, 4 }
 0xc27   : > { %v1957_v54 = vperm.slane %v1953_v51, %v3479_v50 }
 0xc28   : > { %v1964_v43 = vsel %vm654_vm5, %v1963_v19, %v1944_v53  ;;  %v1983_v57 = vrot.slane %v1962_v52, 4 }
 0xc29   : > { %v1968_v7 = vperm.slane %v1964_v43, %v3479_v50  ;;  %v1972_v31 = vsel %vm654_vm5, %v1957_v54, %v1971_v55  ;;  %v1969_v58 = vrot.slane %v1957_v54, 4 }
 0xc2a   : > { %v1980_v5 = vperm.slane %v1972_v31, %v3484_v61 }
 0xc2b   : > { %v1984_v60 = vsel %vm654_vm5, %v1968_v7, %v1983_v57  ;;  %v1970_v62 = vsel %vm654_vm5, %v1969_v58, %v1951_v48  ;;  %v1981_v1 = vrot.slane %v1968_v7, 4 }
 0xc2c   : > { %v1992_v2 = vperm.slane %v1984_v60, %v3484_v61  ;;  %v1999_v28 = vrot.slane %v1980_v5, 4  ;;  %v1976_v35 = vperm.slane %v1970_v62, %v3484_v61 }
 0xc2d   : > { %v1982_v3 = vsel %vm654_vm5, %v1981_v1, %v1962_v52 }
 0xc2e   : > { %v2000_v4 = vsel %vm654_vm5, %v1992_v2, %v1999_v28  ;;  %v1988_v6 = vperm.slane %v1982_v3, %v3484_v61  ;;  %v1995_v10 = vrot.slane %v1976_v35, 4  ;;  %v1997_v11 = vrot.slane %v1992_v2, 4 }
 0xc2f   : > { %2236 = vmatpush.msra.mxu2 %v2000_v4 }
 0xc30   : > { %v1996_v12 = vsel %vm654_vm5, %v1988_v6, %v1995_v10  ;;  %v1998_v34 = vsel %vm654_vm5, %v1997_v11, %v1980_v5  ;;  %v1993_v13 = vrot.slane %v1988_v6, 4 }
 0xc31   : > { %2190 = vmatpush.msrb.mxu0 %v1996_v12  ;;  %2213 = vmatpush.msra.mxu1 %v1998_v34 }
 0xc32   : > { %v1994_v14 = vsel %vm654_vm5, %v1993_v13, %v1976_v35 }
 0xc33   : > { %2167 = vmatpush.msra.mxu3 %v1994_v14 }
 0xc76   : > { %v2131_v15 = vpop.xlane.xlu2 %2130 }
 0xc77   : > { %2926 = vrcp.f32 %v2131_v15 }
 0xc7d   : > { %v2927_v16 = vpop.eup %2926 }
 0xc7e   : > { %v2145_v17 = vmul.f32 %v2927_v16, %v3916_v56  ;;  %v2140_v18 = vpop.xlane.xlu2 %2139 }
 0xc7f   : > { %v2134_v20 = vpop.xlane.xlu0 %2133  ;;  %2928 = vrcp.f32 %v2140_v18 }
 0xc80   : > { %2930 = vrcp.f32 %v2134_v20  ;;  %2729 = vmatmul.msk.f32.vlgmr.msra.gmra.mxu3 %vm1018_vm6, %v2145_v17 }
 0xc85   : > { %v2929_v21 = vpop.eup %2928 }
 0xc86   : > { %v2931_v22 = vpop.eup %2930  ;;  %v2148_v23 = vmul.f32 %v2929_v21, %v3920_v9  ;;  %v2137_v24 = vpop.xlane.xlu2 %2136 }
 0xc87   : > { %v2146_v25 = vmul.f32 %v2931_v22, %v3922_v59  ;;  %2932 = vrcp.f32 %v2137_v24 }
 0xc88   : > { %2732 = vmatmul.msk.f32.vlgmr.msra.gmra.mxu2 %vm1018_vm6, %v2148_v23 }
 0xc89   : > { %2730 = vmatmul.msk.f32.vlgmr.msrb.gmra.mxu0 %vm1018_vm6, %v2146_v25 }
 0xc8d   : > { %v2933_v26 = vpop.eup %2932 }
 0xc8e   : > { %v2147_v56 = vmul.f32 %v2933_v26, %v3928_v63 }
 0xc90   : > { %2731 = vmatmul.msk.f32.vlgmr.msra.gmra.mxu1 %vm1018_vm6, %v2147_v56 }
 0xd03   : > { %v2169_v27 = vpop.f32.mrf.mxu3 }
 0xd04   : > { %v2243_v40 = vrot.slane %v2169_v27, 4 }
 0xd06   : > { %v2192_v0 = vpop.f32.mrf.mxu0 }
 0xd07   : > { %v2255_v29 = vrot.slane %v2192_v0, 4 }
 0xd0b   : > { %v2238_v38 = vpop.f32.mrf.mxu2 }
 0xd0c   : > { %v2253_v30 = vrot.slane %v2238_v38, 4  ;;  %v2256_v9 = vsel %vm654_vm5, %v2238_v38, %v2255_v29 }
 0xd0d   : > { %v2264_v59 = vperm.slane %v2256_v9, %v3479_v50  ;;  %v2215_v32 = vpop.f32.mrf.mxu1  ;;  %v2734_v9 = vld [vmem:[%s4136_s4 + $0x28] sm:$0xff] }
 0xd0e   : > { %v2254_v33 = vsel %vm654_vm5, %v2253_v30, %v2192_v0  ;;  %v2241_v41 = vrot.slane %v2215_v32, 4  ;;  %v2244_v44 = vsel %vm654_vm5, %v2215_v32, %v2243_v40  ;;  %v2736_v30 = vld [vmem:[%s4136_s4 + $0x38] sm:$0xff] }
 0xd0f   : > { %v2260_v63 = vperm.slane %v2254_v33, %v3479_v50  ;;  %v2277_v45 = vrot.slane %v2264_v59, 4  ;;  %v2252_v37 = vperm.slane %v2244_v44, %v3479_v50  ;;  %2391 = vmatpush.msrb.mxu3 %v2736_v30 }
 0xd10   : > { %v2242_v39 = vsel %vm654_vm5, %v2241_v41, %v2169_v27 }
 0xd11   : > { %v2265_v46 = vrot.slane %v2260_v63, 4  ;;  %v2248_v36 = vperm.slane %v2242_v39, %v3479_v50  ;;  %v2278_v47 = vsel %vm654_vm5, %v2277_v45, %v2252_v37  ;;  %v2279_v48 = vrot.slane %v2252_v37, 4  ;;  %v2887_v37 = vld [vmem:[#allocation7 + $0x1] ss:$0 sm:$0xff] }
 0xd12   : > { %v2284_v49 = vperm.slane %v2278_v47, %v3484_v61 }
 0xd13   : > { %v2266_v19 = vsel %vm654_vm5, %v2265_v46, %v2248_v36  ;;  %v2267_v51 = vrot.slane %v2248_v36, 4  ;;  %v2280_v52 = vsel %vm654_vm5, %v2264_v59, %v2279_v48  ;;  %v2733_v59 = vld [vmem:[%s4136_s4 + $0x20] sm:$0xff] }
 0xd14   : > { %v2272_v53 = vperm.slane %v2266_v19, %v3484_v61  ;;  %v2288_v54 = vperm.slane %v2280_v52, %v3484_v61  ;;  %v2293_v57 = vrot.slane %v2284_v49, 4 }
 0xd15   : > { %v2268_v55 = vsel %vm654_vm5, %v2260_v63, %v2267_v51 }
 0xd16   : > { %v2276_v43 = vperm.slane %v2268_v55, %v3484_v61  ;;  %v2295_v7 = vrot.slane %v2288_v54, 4  ;;  %v2289_v31 = vrot.slane %v2272_v53, 4  ;;  %v2294_v28 = vsel %vm654_vm5, 0.0, %v2293_v57  ;;  %v2740_v54 = vld [vmem:[%s4140_s8 + $0x28] sm:$0xff]  ;;  %v2739_v55 = vld [vmem:[%s4140_s8 + $0x20] sm:$0xff] }
 0xd18   : > { %v2291_v58 = vrot.slane %v2276_v43, 4  ;;  %v2296_v5 = vsel %vm654_vm5, 0.0, %v2295_v7  ;;  %v2308_v60 = vsel %vm654_vm5, %v2295_v7, %v2284_v49  ;;  %v2290_v11 = vsel %vm654_vm5, 0.0, %v2289_v31 }
 0xd19   : > { %v2312_v62 = vperm.slane %v2308_v60, %v3479_v50  ;;  %v2313_v1 = vrot.slane %v2296_v5, 4 }
 0xd1a   : > { %v2292_v2 = vsel %vm654_vm5, 0.0, %v2291_v58  ;;  %v2297_v35 = vsel %vm654_vm5, %v2291_v58, %v2272_v53  ;;  %v2742_v53 = vld [vmem:[%s4140_s8 + $0x38] sm:$0xff] }
 0xd1b   : > { %v2314_v3 = vsel %vm654_vm5, %v2313_v1, %v2294_v28  ;;  %v2301_v4 = vperm.slane %v2297_v35, %v3479_v50  ;;  %v2302_v6 = vrot.slane %v2292_v2, 4  ;;  %v2333_v10 = vrot.slane %v2312_v62, 4  ;;  %2459 = vmatpush.msra.mxu0 %v2742_v53  ;;  %v2888_v2 = vld [vmem:[%s4144_s12 + $0x1] ss:$0 sm:$0xff] }
 0xd1c   : > { %v2318_v12 = vperm.slane %v2314_v3, %v3479_v50  ;;  %v2889_v3 = vld [vmem:[#allocation10 + $0x1] ss:$0 sm:$0xff] }
 0xd1d   : > { %v2303_v34 = vsel %vm654_vm5, %v2302_v6, %v2290_v11  ;;  %v2321_v13 = vrot.slane %v2301_v4, 4  ;;  %v2890_v6 = vld [vmem:[%s4141_s9 + $0x1] ss:$0 sm:$0xff] }
 0xd1e   : > { %v2307_v14 = vperm.slane %v2303_v34, %v3479_v50  ;;  %v2334_v15 = vsel %vm654_vm5, %v2318_v12, %v2333_v10  ;;  %v2331_v16 = vrot.slane %v2318_v12, 4 }
 0xd1f   : > { %v2342_v17 = vperm.slane %v2334_v15, %v3484_v61 }
 0xd20   : > { %v2322_v18 = vsel %vm654_vm5, %v2307_v14, %v2321_v13  ;;  %v2319_v20 = vrot.slane %v2307_v14, 4  ;;  %v2332_v21 = vsel %vm654_vm5, %v2331_v16, %v2312_v62  ;;  %v2753_v14 = vld [vmem:[%s4182_s26 + $0x78] sm:$0xff] }
 0xd21   : > { %v2330_v22 = vperm.slane %v2322_v18, %v3484_v61  ;;  %v2347_v23 = vrot.slane %v2342_v17, 4  ;;  %v2338_v24 = vperm.slane %v2332_v21, %v3484_v61  ;;  %2536 = vmatpush.msrb.mxu1 %v2753_v14  ;;  %v2751_v21 = vld [vmem:[%s4182_s26 + $0x68] sm:$0xff] }
 0xd22   : > { %v2320_v25 = vsel %vm654_vm5, %v2319_v20, %v2301_v4 }
 0xd23   : > { %v2348_v26 = vsel %vm654_vm5, %v2347_v23, %v2330_v22  ;;  %v2326_v50 = vperm.slane %v2320_v25, %v3484_v61  ;;  %v2343_v56 = vrot.slane %v2338_v24, 4  ;;  %v2349_v38 = vrot.slane %v2330_v22, 4  ;;  %v2735_v61 = vld [vmem:[%s4136_s4 + $0x30] sm:$0xff] }
 0xd24   : > { %2356 = vrot.lane.b32.xlu2 %v2348_v26, %s3182_s5  ;;  %2392 = vmatpush.msrb.mxu3 %v2735_v61  ;;  %v2749_v26 = vld [vmem:[%s4182_s26 + $0x58] sm:$0xff] }
 0xd25   : > { %v2345_v0 = vrot.slane %v2326_v50, 4  ;;  %v2344_v27 = vsel %vm654_vm5, %v2343_v56, %v2326_v50  ;;  %v2350_v40 = vsel %vm654_vm5, %v2342_v17, %v2349_v38  ;;  %v2752_v17 = vld [vmem:[%s4182_s26 + $0x70] sm:$0xff] }
 0xd26   : > { %2393 = vmatpush.msrb.mxu3 %v2734_v9  ;;  %2537 = vmatpush.msrb.mxu1 %v2752_v17 }
 0xd27   : > { %v2346_v29 = vsel %vm654_vm5, %v2338_v24, %v2345_v0  ;;  %v2750_v24 = vld [vmem:[%s4182_s26 + $0x60] sm:$0xff]  ;;  %v2748_v0 = vld [vmem:[%s4182_s26 + $0x50] sm:$0xff] }
 0xd28   : > { %2352 = vrot.lane.b32.xlu1 %v2346_v29, %s3183_s13  ;;  %2394 = vmatpush.msrb.mxu3 %v2733_v59  ;;  %v2747_v29 = vld [vmem:[%s4182_s26 + $0x48] sm:$0xff]  ;;  %s4184_s13 = sld [smem:[#allocation29_spill]] }
 0xd29   : > { %2538 = vmatpush.msrb.mxu1 %v2751_v21 }
 0xd2b   : > { %2539 = vmatpush.msrb.mxu1 %v2750_v24 }
 0xd2d   : > { %2540 = vmatpush.msrb.mxu1 %v2749_v26 }
 0xd2e   : > { %s2561_s19 = scalar_lea.hbm %s4184_s13, %s2757_s15  ;;  %s3109_s11 = scalar_lea.hbm %s4184_s13, 16 }
 0xd2f   : > { %2541 = vmatpush.msrb.mxu1 %v2748_v0  ;;  %s2565_s25 = sshll.u32 %s2561_s19, 4  ;;  %s2566_s25 = int_to_ptr.hbm [resolvable:$true] %s2565_s25 }
 0xd30   : > { %2360 = vrot.lane.b32.xlu1 %v2350_v40, %s3184_s22  ;;  %v2746_v40 = vld [vmem:[%s4182_s26 + $0x40] sm:$0xff]  ;;  %s3103_s24 = sshra.s32 %s2566_s25, 4  ;;  %s3104_s24 = int_to_ptr.hbm [resolvable:$true] %s3103_s24 }
 0xd31   : > { %2542 = vmatpush.msrb.mxu1 %v2747_v29  ;;  %s3105_s29 = scalar_lea.hbm %s3104_s24, 8  ;;  %p3110_p7 = scmp.lt.s32.totalorder %s3104_s24, %s4184_s13 }
 0xd32   : > { %p3106_p1 = scmp.ne.s32.totalorder %s3104_s24, %s3105_s29  ;;  %p3111_p9 = scmp.lt.s32.totalorder %s3109_s11, %s3105_s29 }
 0xd33   : > { %2543 = vmatpush.msrb.mxu1 %v2746_v40 }
 0xd34   : > { %p3107_p3 = pnand %p3106_p1, %p3340_p0  ;;  %p3112_p8 = por %p3111_p9, %p3110_p7 }
 0xd36   : > { %p3108_p13 = pneg %p3107_p3 }
 0xd38   : > { %p3113_p10 = pnand %p3112_p8, %p3108_p13 }
 0xd7e   : > { %v2357_v41 = vpop.permute.xlu2 %2356 }
 0xd9a   : > { %v2353_v32 = vpop.permute.xlu1 %2352 }
 0xd9b   : > { %v2363_v33 = vsel %vm1018_vm6, %v2344_v27, %v2353_v32 }
 0xd9c   : > { %v2364_v63 = vsel %vm1382_vm7, %v2363_v33, %v2357_v41 }
 0xda2   : > { %v2361_v44 = vpop.permute.xlu1 %2360 }
 0xda3   : > { %v2365_v45 = vsel %vm1384_vm8, %v2364_v63, %v2361_v44 }
 0xda4   : > { %2737 = vmatmul.msk.f32.vlgmr.msrb.gmra.mxu3 %vm573_vm0, %v2365_v45 }
 0xe27   : > { %v2396_v39 = vpop.f32.mrf.mxu3 }
 0xe28   : > { %v2397_v46 = vadd.f32 %v2887_v37, %v2396_v39 }
 0xe2a   : > { %v4040_v36 = vadd.f32 %v2397_v46, %v3763_v42  ;;  %v2741_v42 = vld [vmem:[%s4140_s8 + $0x30] sm:$0xff] }
 0xe2b   : > { %2460 = vmatpush.msra.mxu0 %v2741_v42 }
 0xe2c   : > { %v2404_v47 = vsel %vm573_vm0, %v4040_v36, 0.0 }
 0xe2d   : > { %2405 = vadd.xlane.f32.xlu1 %v2404_v47  ;;  %2461 = vmatpush.msra.mxu0 %v2740_v54 }
 0xe2f   : > { %2462 = vmatpush.msra.mxu0 %v2739_v55 }
 0xea0   : > { %v2406_v48 = vpop.xlane.xlu1 %2405 }
 0xea1   : > { %v2407_v49 = vmul.f32 %v2406_v48, %v3425_v8 }
 0xea3   : > { %v2408_v19 = vsub.f32 %v4040_v36, %v2407_v49 }
 0xea5   : > { %v2409_v51 = vmul.f32 %v2408_v19, %v2408_v19 }
 0xea7   : > { %v2410_v52 = vsel %vm573_vm0, %v2409_v51, 0.0 }
 0xea8   : > { %2411 = vadd.xlane.f32.xlu2 %v2410_v52 }
 0xf1b   : > { %v2412_v43 = vpop.xlane.xlu2 %2411 }
 0xf1c   : > { %v2413_v57 = vmul.f32 %v2412_v43, %v3425_v8 }
 0xf1e   : > { %v2414_v7 = vadd.f32 1e-06, %v2413_v57 }
 0xf20   : > { %2934 = vrsqrt.f32 %v2414_v7  ;;  %vm2421_vm6 = vweird.f32 %v2414_v7 }
 0xf26   : > { %v2935_v31 = vpop.eup %2934 }
 0xf27   : > { %v2416_v58 = vmul.f32 %v2935_v31, %v2414_v7  ;;  %vm2422_vm5 = vweird.f32 %v2935_v31  ;;  %v2891_v7 = vld [vmem:[%s4183_s28 + $0x1] ss:$0 sm:$0xff] }
 0xf28   : > { %vm2423_vm7 = vmor %vm2421_vm6, %vm2422_vm5 }
 0xf29   : > { %v2417_v5 = vmul.f32 %v2935_v31, %v2416_v58 }
 0xf2b   : > { %v2418_v60 = vmul.f32 0.5, %v2417_v5 }
 0xf2d   : > { %v2419_v62 = vsub.f32 1.5, %v2418_v60 }
 0xf2f   : > { %v2420_v1 = vmul.f32 %v2935_v31, %v2419_v62 }
 0xf31   : > { %v2424_v28 = vsel %vm2423_vm7, %v2935_v31, %v2420_v1 }
 0xf32   : > { %v2425_v35 = vmul.f32 %v2424_v28, %v2408_v19 }
 0xf34   : > { %v2429_v4 = vmul.f32 %v2888_v2, %v2425_v35 }
 0xf36   : > { %v2433_v8 = vadd.f32 %v2889_v3, %v2429_v4 }
 0xf38   : > { %2744 = vmatmul.msk.f32.vlgmr.msra.gmra.mxu0 %vm573_vm0, %v2433_v8 }
 0xfb5   : > { %v2464_v10 = vpop.f32.mrf.mxu0 }
 0xfb6   : > { %v2465_v11 = vadd.f32 %v2890_v6, %v2464_v10 }
 0xfb8   : > { %v2468_v12 = vmul.f32 0.70710677, %v2465_v11  ;;  %v2467_v55 = vmul.f32 0.5, %v2465_v11 }
 0xfba   : > { %v2469_v34 = vmul.f32 %v2468_v12, %v2468_v12 }
 0xfbc   : > { %v2470_v13 = vmin.f32 %v2469_v34, 16.0 }
 0xfbe   : > { %v2471_v15 = vmul.f32 2.1237322e-06, %v2470_v13  ;;  %v2482_v16 = vmul.f32 3.8918573e-05, %v2470_v13 }
 0xfc0   : > { %v2472_v18 = vadd.f32 0.00028619796, %v2471_v15  ;;  %v2483_v20 = vadd.f32 0.001143296, %v2482_v16 }
 0xfc2   : > { %v2473_v22 = vmul.f32 %v2472_v18, %v2470_v13  ;;  %v2484_v23 = vmul.f32 %v2483_v20, %v2470_v13 }
 0xfc4   : > { %v2485_v25 = vadd.f32 0.014752088, %v2484_v23  ;;  %v2474_v50 = vadd.f32 0.0036580483, %v2473_v22 }
 0xfc6   : > { %v2486_v56 = vmul.f32 %v2485_v25, %v2470_v13  ;;  %v2475_v38 = vmul.f32 %v2474_v50, %v2470_v13 }
 0xfc8   : > { %v2487_v27 = vadd.f32 0.112945676, %v2486_v56  ;;  %v2476_v9 = vadd.f32 0.05243302, %v2475_v38 }
 0xfca   : > { %v2488_v30 = vmul.f32 %v2487_v27, %v2470_v13  ;;  %v2477_v33 = vmul.f32 %v2476_v9, %v2470_v13 }
 0xfcc   : > { %v2489_v61 = vadd.f32 0.4994258, %v2488_v30  ;;  %v2478_v41 = vadd.f32 0.18741608, %v2477_v33 }
 0xfce   : > { %v2490_v59 = vmul.f32 %v2489_v61, %v2470_v13  ;;  %v2479_v63 = vmul.f32 %v2478_v41, %v2470_v13 }
 0xfd0   : > { %v2491_v32 = vadd.f32 1.0, %v2490_v59  ;;  %v2480_v46 = vadd.f32 1.1283791, %v2479_v63 }
 0xfd2   : > { %2936 = vrcp.f32 %v2491_v32  ;;  %v2503_v39 = vand.u32 2147483648, %v2491_v32  ;;  %v2501_v48 = vand.u32 2147483647, %v2491_v32  ;;  %vm2497_vm9 = vweird.f32 %v2491_v32 }
 0xfd3   : > { %v2481_v51 = vmul.f32 %v2480_v46, %v2468_v12 }
 0xfd4   : > { %v2504_v19 = vor.u32 1.1754944e-38, %v2503_v39  ;;  %vm2502_vm11 = vcmp.eq.f32.partialorder %v2501_v48, 8.507059e+37 }
 0xfd8   : > { %v2937_v44 = vpop.eup %2936 }
 0xfd9   : > { %v2493_v45 = vmul.f32 %v2937_v44, %v2491_v32  ;;  %vm2498_vm8 = vweird.f32 %v2937_v44 }
 0xfda   : > { %vm2499_vm10 = vmor %vm2497_vm9, %vm2498_vm8 }
 0xfdb   : > { %v2494_v37 = vsub.f32 1.0, %v2493_v45 }
 0xfdd   : > { %v2495_v47 = vmul.f32 %v2937_v44, %v2494_v37 }
 0xfdf   : > { %v2496_v49 = vadd.f32 %v2937_v44, %v2495_v47 }
 0xfe1   : > { %v2500_v52 = vsel %vm2499_vm10, %v2937_v44, %v2496_v49 }
 0xfe2   : > { %v2505_v53 = vsel %vm2502_vm11, %v2504_v19, %v2500_v52 }
 0xfe3   : > { %v2506_v42 = vmul.f32 %v2505_v53, %v2481_v51 }
 0xfe5   : > { %v2745_v54 = vclamps-f32 %v2506_v42, 1.0 }
 0xfe7   : > { %v2509_v43 = vadd.f32 1.0, %v2745_v54 }
 0xfe9   : > { %v2510_v57 = vmul.f32 %v2509_v43, %v2467_v55 }
 0xfeb   : > { %2755 = vmatmul.msk.f32.vlgmr.msrb.gmra.mxu1 %vm1537_vm1, %v2510_v57 }
0x1068   : > { %v2545_v31 = vpop.f32.mrf.mxu1 }
0x1069   : > { %v2546_v58 = vadd.f32 %v2891_v7, %v2545_v31 }
0x106b   : > { %v2548_v5 = vadd.f32 %v2546_v58, %v4040_v36 }
0x106d   : > { %2549 = vst.msk [vmem:[%s568_s18] sm:$0xff] %vm573_vm0, %v2548_v5 }
0x106e   : > { %3116 = shalt.err (!%p3113_p10)
}
0x106f   : > { %2776 = dma.vmem_to_hbm [thread:$0]  (%p3340_p0), %s2564_s7, 128, %s2566_s25, %s2551_s20  }
0x1070 PF: > { %s4187_s14 = sld [smem:[#allocation17_spill]] }
0x1071   : > { %s4189_s21 = sld [smem:[#allocation19_spill]] }
0x1076   : > { %s2577_s5 = sand.u32 1, %s4187_s14  }
0x1077   : > { %p4190_p11 = scmp.ge.s32.totalorder %s4189_s21, 2  ;;  %s2578_s19 = scalar_lea.sflag [#allocation4], %s2577_s5 }
0x1079   : > { %p2796_p5 = pnand %p4190_p11, %p3348_p6 }
0x107b   : > { %p2797_p12 = pneg %p2796_p5 }
0x107d   : > { %3150 = dma.done.wait (%p2797_p12), %s2578_s19, 128  }
0x107e   : > { %3152 = vsyncadd (%p2797_p12), %s2578_s19, 4294967168  ;;  %s4191_s16 = sld [smem:[#allocation20_spill]]  ;;  %s4194_s29 = smov %s3159_s30 }
0x107f   : > { %s4192_s27 = sld [smem:[#allocation18_spill]] }
0x1080   : > { %s4193_s15 = sld [smem:[#allocation21_spill]] }
0x1084   : > { %p31_p2 = scmp.ge.s32.totalorder %s4191_s16, 4  }
0x1085   : > { %s4195_s30 = smov %s4192_s27 }
0x1086   :  { %33 = sbr.rel (!%p31_p2) target bundleno = 15 (0xf), region = 158 }
0x108b   :  { %2584 = vsyncpa [#allocation3], 1 }
0x108c   :  { %2586 = vsyncpa [#allocation3 + $0x1], 1 }
0x108d   :  { %2587 = vsyncpa [#allocation6], 1 }
0x108e   :  { %2589 = vsyncpa [#allocation6 + $0x1], 1 }
0x108f   :  { %2590 = vsyncpa [#allocation9], 1 }
0x1090   :  { %2591 = vsyncpa [#allocation4], 1 }
0x1091   :  { %2593 = vsyncpa [#allocation4 + $0x1], 1 }

</bundles_post_ra>
